<compile_context>
chip_gen: v6e
topology: v6e:2x2x1
jax: 0.10.0
libtpu: 0.0.40
codegen_flags: <defaults>
</compile_context>

<pallas_src>
import jax
import jax.numpy as jnp
from jax.experimental import pallas as pl
from jax.experimental.pallas import tpu as pltpu

# ---------------- small config consistent with the module ----------------
TGT_VOCAB = 64      # config.tgt_vocab_size
EMB       = 32      # config.embedding_size (must equal de_hidden_size)
EN_H      = 32      # config.en_hidden_size
DE_H      = 32      # config.de_hidden_size
ATTN_H    = 32      # hidden size of the additive-attention scorer
N_LAYERS  = 2       # config.de_num_layers
PAD_IDX   = 0       # config.pad_idx
BATCH     = 2
SRC_LEN   = 8
T_STEPS   = 4       # teacher-forced decode steps used in the test

SUBLANE = 8
LANE    = 128
NEG_INF = -1e9


# --------------------------- Pallas kernel --------------------------------
def decoder_kernel(emb_ref, h0_ref, c0_ref, enc_ref, eproj_ref, mask_ref,
                   wah_ref, va_ref, wemb_ref, wctx_ref, bcomb_ref,
                   wx_ref, wh_ref, blstm_ref, wout_ref, bout_ref,
                   logp_ref, hc_ref, h_scr, c_scr):
    f32 = jnp.float32
    t = pl.program_id(0)
    T = pl.num_programs(0)
    L, Bp, H = h_scr.shape

    # ---- initialize carried state from the caller-provided hidden at t==0 ----
    @pl.when(t == 0)
    def _():
        h_scr[...] = h0_ref[...]
        c_scr[...] = c0_ref[...]

    # ---- embedding for this step (gather hoisted to wrapper) ----
    emb = emb_ref[0]                                               # (Bp, E)
    # em_dropout: identity (inference mode)

    # ---- additive attention over encoder outputs, query = last-layer h ----
    # TODO(synk): LSTMRNNDecoderAttention source not provided; standard
    # Bahdanau-style additive attention with src_lens masking implemented.
    h_last = h_scr[L - 1]                                          # (Bp, H)
    h_proj = jnp.dot(h_last, wah_ref[...], preferred_element_type=f32)   # (Bp, Ha)
    energy = jnp.tanh(h_proj[:, None, :] + eproj_ref[...])               # (Bp, S, Ha)
    scores = jnp.sum(energy * va_ref[...][None, :, :], axis=2)           # (Bp, S)
    scores = scores + mask_ref[...]                                # step-invariant bias
    scores = scores - jnp.max(scores, axis=1, keepdims=True)
    ew = jnp.exp(scores)
    inv_den = pl.reciprocal(jnp.sum(ew, axis=1, keepdims=True), approx=True)
    attn_w = ew * inv_den                                          # (Bp, S)

    # context = attn_w.bmm(encoder_output)
    context = jnp.sum(attn_w[:, :, None] * enc_ref[...], axis=1)   # (Bp, He)

    # ---- attn_combine split (no lane concat): emb@W_emb + ctx@W_ctx + b, ReLU ----
    x = jnp.maximum(
        jnp.dot(emb, wemb_ref[...], preferred_element_type=f32)
        + jnp.dot(context, wctx_ref[...], preferred_element_type=f32)
        + bcomb_ref[...],
        0.0)                                                       # (Bp, H)

    # ---- stacked LSTM, one step per layer ----
    # gates = x@Wx[l] + h@Wh[l] + b[l]; g-gate columns pre-scaled x2 offline so a
    # single full-width sigmoid suffices: tanh(g) = 2*sigmoid(2g) - 1.
    for l in range(L):
        h_prev = h_scr[l]
        c_prev = c_scr[l]
        gates = (jnp.dot(x, wx_ref[l], preferred_element_type=f32)
                 + jnp.dot(h_prev, wh_ref[l], preferred_element_type=f32)
                 + blstm_ref[l])                                   # (Bp, 4H) lane-dense
        s = jax.nn.sigmoid(gates)                                  # one EUP pass
        i_g = s[:, 0 * H:1 * H]
        f_g = s[:, 1 * H:2 * H]
        g_g = 2.0 * s[:, 2 * H:3 * H] - 1.0                        # = tanh(g_orig)
        o_g = s[:, 3 * H:4 * H]
        c_new = f_g * c_prev + i_g * g_g
        h_new = o_g * jnp.tanh(c_new)
        h_scr[l] = h_new
        c_scr[l] = c_new
        x = h_new
    # lstm_dropout: identity (inference mode)

    # ---- output projection (lane-padded to 128) + LogSoftmax(dim=1) ----
    logits = jnp.dot(x, wout_ref[...], preferred_element_type=f32) + bout_ref[...]
    m = jnp.max(logits, axis=1, keepdims=True)
    lse = jnp.log(jnp.sum(jnp.exp(logits - m), axis=1, keepdims=True)) + m
    logp_ref[0] = logits - lse

    # ---- final state: one lane-dense (Bp, 2*L*H) store on the last step ----
    @pl.when(t == T - 1)
    def _():
        parts = []
        for l in range(L):
            parts.append(h_scr[l])
            parts.append(c_scr[l])
        hc_ref[...] = jnp.concatenate(parts, axis=1)


# ----------------------------- wrappers ------------------------------------
@jax.jit
def _decode_steps(ids_steps, h0, c0, enc, src_lens, kp):
    """Teacher-forced multi-step decode inside a single pallas_call."""
    T, B = ids_steps.shape
    L, _, H = h0.shape
    S = enc.shape[1]

    # sublane-pad the batch so every vector row / store is unmasked.
    Bp = max(SUBLANE, ((B + SUBLANE - 1) // SUBLANE) * SUBLANE)
    pad_b = Bp - B
    ids_p  = jnp.pad(ids_steps.astype(jnp.int32), ((0, 0), (0, pad_b)))
    lens_p = jnp.pad(src_lens.astype(jnp.int32), (0, pad_b))
    h0_p   = jnp.pad(h0.astype(jnp.float32), ((0, 0), (0, pad_b), (0, 0)))
    c0_p   = jnp.pad(c0.astype(jnp.float32), ((0, 0), (0, pad_b), (0, 0)))
    enc_p  = jnp.pad(enc.astype(jnp.float32), ((0, pad_b), (0, 0), (0, 0)))

    # Step-invariant precompute, done once for the whole decode (fused by jit):
    emb_steps = kp["emb"][ids_p]                                        # (T, Bp, E)
    eproj = jnp.einsum("bse,eh->bsh", enc_p, kp["wae"]) + kp["ba"][None]  # (Bp, S, Ha)
    pos = jnp.arange(S, dtype=jnp.int32)[None, :]
    mask_bias = jnp.where(pos < lens_p[:, None], 0.0, NEG_INF).astype(jnp.float32)

    Vp = kp["wout"].shape[1]            # lane-padded vocab width (128)

    def cspec(x):                       # constant (resident) full-array block
        nd = x.ndim
        return pl.BlockSpec(x.shape, lambda t, _nd=nd: (0,) * _nd)

    in_specs = [
        pl.BlockSpec((1, Bp, emb_steps.shape[2]), lambda t: (t, 0, 0)),
        cspec(h0_p), cspec(c0_p), cspec(enc_p), cspec(eproj), cspec(mask_bias),
        cspec(kp["wah"]), cspec(kp["va"]),
        cspec(kp["w_emb"]), cspec(kp["w_ctx"]), cspec(kp["bcomb"]),
        cspec(kp["wx"]), cspec(kp["wh"]), cspec(kp["blstm"]),
        cspec(kp["wout"]), cspec(kp["bout"]),
    ]
    out_specs = (
        pl.BlockSpec((1, Bp, Vp), lambda t: (t, 0, 0)),
        pl.BlockSpec((Bp, 2 * L * H), lambda t: (0, 0)),
    )
    out_shapes = (
        jax.ShapeDtypeStruct((T, Bp, Vp), jnp.float32),
        jax.ShapeDtypeStruct((Bp, 2 * L * H), jnp.float32),
    )

    logp_all, hc = pl.pallas_call(
        decoder_kernel,
        grid=(T,),
        out_shape=out_shapes,
        in_specs=in_specs,
        out_specs=out_specs,
        scratch_shapes=[pltpu.VMEM((L, Bp, H), jnp.float32),
                        pltpu.VMEM((L, Bp, H), jnp.float32)],
        compiler_params=pltpu.CompilerParams(
            dimension_semantics=("arbitrary",)),
    )(emb_steps, h0_p, c0_p, enc_p, eproj, mask_bias,
      kp["wah"], kp["va"], kp["w_emb"], kp["w_ctx"], kp["bcomb"],
      kp["wx"], kp["wh"], kp["blstm"], kp["wout"], kp["bout"])

    logp = logp_all[:, :B, :TGT_VOCAB]
    h = jnp.stack([hc[:B, l * 2 * H: l * 2 * H + H] for l in range(L)], axis=0)
    c = jnp.stack([hc[:B, l * 2 * H + H: (l + 1) * 2 * H] for l in range(L)], axis=0)
    return logp, (h, c)


def att_bilstm_rnn_decoder_steps(ids_steps, hidden, encoder_output, src_lens, kp):
    """ids_steps: (T, B) teacher-forced tokens. Returns ((T,B,V) log-probs, (h,c))."""
    h0, c0 = hidden
    return _decode_steps(ids_steps, h0, c0, encoder_output, src_lens, kp)


def att_bilstm_rnn_decoder(ids, hidden, encoder_output, src_lens, kp):
    """Single decoder step (matches the original forward signature)."""
    logp, (h, c) = att_bilstm_rnn_decoder_steps(ids[None], hidden,
                                                encoder_output, src_lens, kp)
    return logp[0], (h, c)


# ----------------------- parameters & reference ----------------------------
def init_params(key):
    """PyTorch-style parameters (used directly by the pure-JAX reference)."""
    ks = jax.random.split(key, 13)

    def u(k, shape, scale=0.1):
        return jax.random.uniform(k, shape, jnp.float32, -scale, scale)

    emb = u(ks[0], (TGT_VOCAB, EMB)).at[PAD_IDX].set(0.0)   # padding_idx row zero
    # additive attention: score = v . tanh(Wh h + We e + b)
    attn_wh = u(ks[1], (ATTN_H, DE_H))
    attn_we = u(ks[2], (ATTN_H, EN_H))
    attn_b  = u(ks[3], (ATTN_H,))
    attn_v  = u(ks[4], (ATTN_H,))
    # attn_combine Linear(EMB + EN_H -> DE_H): y = x @ W.T + b
    comb_w = u(ks[5], (DE_H, EMB + EN_H))
    comb_b = u(ks[6], (DE_H,))
    # LSTM, PyTorch layout, gate order i,f,g,o
    w_ih = u(ks[7], (N_LAYERS, 4 * DE_H, DE_H))
    w_hh = u(ks[8], (N_LAYERS, 4 * DE_H, DE_H))
    b_ih = u(ks[9], (N_LAYERS, 4 * DE_H))
    b_hh = u(ks[10], (N_LAYERS, 4 * DE_H))
    # output Linear(DE_H -> V)
    out_w = u(ks[11], (TGT_VOCAB, DE_H))
    out_b = u(ks[12], (TGT_VOCAB,))
    return dict(emb=emb, attn_wh=attn_wh, attn_we=attn_we, attn_b=attn_b,
                attn_v=attn_v, comb_w=comb_w, comb_b=comb_b,
                w_ih=w_ih, w_hh=w_hh, b_ih=b_ih, b_hh=b_hh,
                out_w=out_w, out_b=out_b)


def prepare_kernel_params(p):
    """Fused / pre-transposed / pre-scaled / lane-padded layout for the kernel."""
    H = DE_H
    wah = p["attn_wh"].T                        # (DE_H, ATTN_H)
    wae = p["attn_we"].T                        # (EN_H, ATTN_H)  (wrapper eproj)
    ba  = p["attn_b"][None, :]                  # (1, ATTN_H)     (folded into eproj)
    va  = p["attn_v"][None, :]                  # (1, ATTN_H)
    # attn_combine split so no in-kernel lane concat is needed
    wcomb = p["comb_w"].T                       # (EMB + EN_H, DE_H)
    w_emb = wcomb[:EMB, :]                      # (EMB, DE_H)
    w_ctx = wcomb[EMB:, :]                      # (EN_H, DE_H)
    bcomb = p["comb_b"][None, :]                # (1, DE_H)
    # LSTM gates, gate order i,f,g,o; pre-scale the g-gate columns by 2 so the
    # kernel can use a single sigmoid pass (tanh(g) = 2*sigmoid(2g) - 1).
    gate_scale = jnp.ones((4 * H,), jnp.float32).at[2 * H:3 * H].set(2.0)
    wx = p["w_ih"].transpose(0, 2, 1) * gate_scale                     # (L, H, 4H)
    wh = p["w_hh"].transpose(0, 2, 1) * gate_scale                     # (L, H, 4H)
    blstm = ((p["b_ih"] + p["b_hh"]) * gate_scale)[:, None, :]         # (L, 1, 4H)
    # output projection, lane-padded to 128; pad bias = -1e9 so padded columns
    # never affect the max / logsumexp.
    Vp = max(LANE, pl.cdiv(TGT_VOCAB, LANE) * LANE)
    wout = jnp.zeros((H, Vp), jnp.float32).at[:, :TGT_VOCAB].set(p["out_w"].T)
    bout = jnp.full((1, Vp), NEG_INF, jnp.float32).at[0, :TGT_VOCAB].set(p["out_b"])
    return dict(emb=p["emb"], wah=wah, wae=wae, ba=ba, va=va,
                w_emb=w_emb, w_ctx=w_ctx, bcomb=bcomb,
                wx=wx, wh=wh, blstm=blstm, wout=wout, bout=bout)


def reference_step(ids, hidden, enc, src_lens, p):
    """Pure-JAX reference mirroring one PyTorch forward step."""
    h0, c0 = hidden
    H = DE_H
    emb = p["emb"][ids]                                             # (B, E)
    h_last = h0[-1]
    e_proj = jnp.einsum("bse,he->bsh", enc, p["attn_we"])
    h_proj = h_last @ p["attn_wh"].T
    energy = jnp.tanh(h_proj[:, None, :] + e_proj + p["attn_b"][None, None, :])
    scores = jnp.einsum("bsh,h->bs", energy, p["attn_v"])
    pos = jnp.arange(enc.shape[1])[None, :]
    scores = jnp.where(pos < src_lens[:, None], scores, NEG_INF)
    attn_w = jax.nn.softmax(scores, axis=1)
    context = jnp.einsum("bs,bsh->bh", attn_w, enc)
    x = jax.nn.relu(jnp.concatenate([emb, context], axis=1) @ p["comb_w"].T
                    + p["comb_b"])
    hs, cs = [], []
    for l in range(h0.shape[0]):
        h_prev, c_prev = h0[l], c0[l]
        gates = (x @ p["w_ih"][l].T + h_prev @ p["w_hh"][l].T
                 + p["b_ih"][l] + p["b_hh"][l])
        i_g = jax.nn.sigmoid(gates[:, 0 * H:1 * H])
        f_g = jax.nn.sigmoid(gates[:, 1 * H:2 * H])
        g_g = jnp.tanh(gates[:, 2 * H:3 * H])
        o_g = jax.nn.sigmoid(gates[:, 3 * H:4 * H])
        c_new = f_g * c_prev + i_g * g_g
        h_new = o_g * jnp.tanh(c_new)
        hs.append(h_new); cs.append(c_new)
        x = h_new
    logits = x @ p["out_w"].T + p["out_b"]
    return jax.nn.log_softmax(logits, axis=1), (jnp.stack(hs), jnp.stack(cs))


def reference_steps(ids_steps, hidden, enc, src_lens, p):
    h, c = hidden
    outs = []
    for t in range(ids_steps.shape[0]):
        logp, (h, c) = reference_step(ids_steps[t], (h, c), enc, src_lens, p)
        outs.append(logp)
    return jnp.stack(outs, axis=0), (h, c)


if __name__ == "__main__":
    key = jax.random.PRNGKey(0)
    kparam, kx, kh, kc, ke = jax.random.split(key, 5)
    params = init_params(kparam)
    kernel_params = prepare_kernel_params(params)

    ids_steps = jax.random.randint(kx, (T_STEPS, BATCH), 1, TGT_VOCAB)  # teacher forcing
    h0 = 0.1 * jax.random.normal(kh, (N_LAYERS, BATCH, DE_H), jnp.float32)
    c0 = 0.1 * jax.random.normal(kc, (N_LAYERS, BATCH, DE_H), jnp.float32)
    enc = 0.1 * jax.random.normal(ke, (BATCH, SRC_LEN, EN_H), jnp.float32)
    src_lens = jnp.array([SRC_LEN, SRC_LEN - 3], jnp.int32)

    # multi-step decode, all T steps inside one pallas_call
    logp_all, (h, c) = att_bilstm_rnn_decoder_steps(
        ids_steps, (h0, c0), enc, src_lens, kernel_params)
    jax.block_until_ready((logp_all, h, c))

    r_logp_all, (r_h, r_c) = reference_steps(ids_steps, (h0, c0), enc, src_lens, params)
    assert jnp.allclose(logp_all, r_logp_all, atol=1e-3, rtol=1e-3), \
        float(jnp.max(jnp.abs(logp_all - r_logp_all)))
    assert jnp.allclose(h, r_h, atol=1e-3, rtol=1e-3)
    assert jnp.allclose(c, r_c, atol=1e-3, rtol=1e-3)

    # single-step wrapper (original forward signature) sanity check
    logp1, (h1, c1) = att_bilstm_rnn_decoder(
        ids_steps[0], (h0, c0), enc, src_lens, kernel_params)
    jax.block_until_ready((logp1, h1, c1))
    r_logp1, (r_h1, r_c1) = reference_step(ids_steps[0], (h0, c0), enc, src_lens, params)
    assert jnp.allclose(logp1, r_logp1, atol=1e-3, rtol=1e-3)
    assert jnp.allclose(h1, r_h1, atol=1e-3, rtol=1e-3)
    assert jnp.allclose(c1, r_c1, atol=1e-3, rtol=1e-3)

    print("KERNEL_OK")
</pallas_src>

<mosaic_0001>
module attributes {stable_mosaic.version = 11 : i64} {
  func.func @decoder_kernel(%arg0: i32, %arg1: memref<1x8x32xf32, #tpu.memory_space<vmem>>, %arg2: memref<2x8x32xf32, #tpu.memory_space<vmem>>, %arg3: memref<2x8x32xf32, #tpu.memory_space<vmem>>, %arg4: memref<8x8x32xf32, #tpu.memory_space<vmem>>, %arg5: memref<8x8x32xf32, #tpu.memory_space<vmem>>, %arg6: memref<8x8xf32, #tpu.memory_space<vmem>>, %arg7: memref<32x32xf32, #tpu.memory_space<vmem>>, %arg8: memref<1x32xf32, #tpu.memory_space<vmem>>, %arg9: memref<32x32xf32, #tpu.memory_space<vmem>>, %arg10: memref<32x32xf32, #tpu.memory_space<vmem>>, %arg11: memref<1x32xf32, #tpu.memory_space<vmem>>, %arg12: memref<2x32x128xf32, #tpu.memory_space<vmem>>, %arg13: memref<2x32x128xf32, #tpu.memory_space<vmem>>, %arg14: memref<2x1x128xf32, #tpu.memory_space<vmem>>, %arg15: memref<32x128xf32, #tpu.memory_space<vmem>>, %arg16: memref<1x128xf32, #tpu.memory_space<vmem>>, %arg17: memref<1x8x128xf32, #tpu.memory_space<vmem>>, %arg18: memref<8x128xf32, #tpu.memory_space<vmem>>, %arg19: memref<2x8x32xf32, #tpu.memory_space<vmem>>, %arg20: memref<2x8x32xf32, #tpu.memory_space<vmem>>) attributes {dimension_semantics = [#tpu.dimension_semantics<arbitrary>], iteration_bounds = array<i64: 4>, scalar_prefetch = 0 : i64, scratch_operands = 2 : i64, tpu.core_type = #tpu.core_type<tc>, window_params = [{transform_indices = @transform_0, window_bounds = array<i64: 1, 8, 32>}, {pipeline_mode = #tpu.pipeline_mode<synchronous>, transform_indices = @transform_1, window_bounds = array<i64: 2, 8, 32>}, {pipeline_mode = #tpu.pipeline_mode<synchronous>, transform_indices = @transform_2, window_bounds = array<i64: 2, 8, 32>}, {pipeline_mode = #tpu.pipeline_mode<synchronous>, transform_indices = @transform_3, window_bounds = array<i64: 8, 8, 32>}, {pipeline_mode = #tpu.pipeline_mode<synchronous>, transform_indices = @transform_4, window_bounds = array<i64: 8, 8, 32>}, {pipeline_mode = #tpu.pipeline_mode<synchronous>, transform_indices = @transform_5, window_bounds = array<i64: 8, 8>}, {pipeline_mode = #tpu.pipeline_mode<synchronous>, transform_indices = @transform_6, window_bounds = array<i64: 32, 32>}, {pipeline_mode = #tpu.pipeline_mode<synchronous>, transform_indices = @transform_7, window_bounds = array<i64: 1, 32>}, {pipeline_mode = #tpu.pipeline_mode<synchronous>, transform_indices = @transform_8, window_bounds = array<i64: 32, 32>}, {pipeline_mode = #tpu.pipeline_mode<synchronous>, transform_indices = @transform_9, window_bounds = array<i64: 32, 32>}, {pipeline_mode = #tpu.pipeline_mode<synchronous>, transform_indices = @transform_10, window_bounds = array<i64: 1, 32>}, {pipeline_mode = #tpu.pipeline_mode<synchronous>, transform_indices = @transform_11, window_bounds = array<i64: 2, 32, 128>}, {pipeline_mode = #tpu.pipeline_mode<synchronous>, transform_indices = @transform_12, window_bounds = array<i64: 2, 32, 128>}, {pipeline_mode = #tpu.pipeline_mode<synchronous>, transform_indices = @transform_13, window_bounds = array<i64: 2, 1, 128>}, {pipeline_mode = #tpu.pipeline_mode<synchronous>, transform_indices = @transform_14, window_bounds = array<i64: 32, 128>}, {pipeline_mode = #tpu.pipeline_mode<synchronous>, transform_indices = @transform_15, window_bounds = array<i64: 1, 128>}, {transform_indices = @transform_16, window_bounds = array<i64: 1, 8, 128>}, {pipeline_mode = #tpu.pipeline_mode<synchronous>, transform_indices = @transform_17, window_bounds = array<i64: 8, 128>}]} {
    %c0_i32 = arith.constant 0 : i32
    %0 = arith.cmpi eq, %arg0, %c0_i32 : i32
    %1 = arith.extui %0 : i1 to i32
    %c0_i32_0 = arith.constant 0 : i32
    %2 = arith.cmpi ne, %1, %c0_i32_0 : i32
    scf.if %2 {
      %c0_93 = arith.constant 0 : index
      %c0_94 = arith.constant 0 : index
      %c0_95 = arith.constant 0 : index
      %146 = vector.load %arg2[%c0_93, %c0_94, %c0_95] : memref<2x8x32xf32, #tpu.memory_space<vmem>>, vector<2x8x32xf32>
      %c0_96 = arith.constant 0 : index
      %c0_97 = arith.constant 0 : index
      %c0_98 = arith.constant 0 : index
      %147 = vector.load %arg19[%c0_96, %c0_97, %c0_98] : memref<2x8x32xf32, #tpu.memory_space<vmem>>, vector<2x8x32xf32>
      tpu.vector_store %arg19[%c0_96, %c0_97, %c0_98], %146 {strides = array<i32>} : memref<2x8x32xf32, #tpu.memory_space<vmem>>, vector<2x8x32xf32>,
      %c0_99 = arith.constant 0 : index
      %c0_100 = arith.constant 0 : index
      %c0_101 = arith.constant 0 : index
      %148 = vector.load %arg3[%c0_99, %c0_100, %c0_101] : memref<2x8x32xf32, #tpu.memory_space<vmem>>, vector<2x8x32xf32>
      %c0_102 = arith.constant 0 : index
      %c0_103 = arith.constant 0 : index
      %c0_104 = arith.constant 0 : index
      %149 = vector.load %arg20[%c0_102, %c0_103, %c0_104] : memref<2x8x32xf32, #tpu.memory_space<vmem>>, vector<2x8x32xf32>
      tpu.vector_store %arg20[%c0_102, %c0_103, %c0_104], %148 {strides = array<i32>} : memref<2x8x32xf32, #tpu.memory_space<vmem>>, vector<2x8x32xf32>,
    } else {
    }
    %c0 = arith.constant 0 : index
    %c0_1 = arith.constant 0 : index
    %c0_2 = arith.constant 0 : index
    %3 = vector.load %arg1[%c0, %c0_1, %c0_2] : memref<1x8x32xf32, #tpu.memory_space<vmem>>, vector<1x8x32xf32>
    %4 = vector.shape_cast %3 : vector<1x8x32xf32> to vector<8x32xf32>
    %c1 = arith.constant 1 : index
    %c0_3 = arith.constant 0 : index
    %c0_4 = arith.constant 0 : index
    %5 = vector.load %arg19[%c1, %c0_3, %c0_4] : memref<2x8x32xf32, #tpu.memory_space<vmem>>, vector<1x8x32xf32>
    %6 = vector.shape_cast %5 : vector<1x8x32xf32> to vector<8x32xf32>
    %c0_5 = arith.constant 0 : index
    %c0_6 = arith.constant 0 : index
    %7 = vector.load %arg7[%c0_5, %c0_6] : memref<32x32xf32, #tpu.memory_space<vmem>>, vector<32x32xf32>
    %cst = arith.constant dense<0.000000e+00> : vector<8x32xf32>
    %8 = tpu.matmul %6, %7, %cst {dimension_numbers = #tpu.dot_dimension_numbers<[1], [0], [0], [1], [0, 0, 1, 1], [], []>} : vector<8x32xf32>, vector<32x32xf32>, vector<8x32xf32> -> vector<8x32xf32>
    %9 = vector.shape_cast %8 : vector<8x32xf32> to vector<8x1x32xf32>
    %c0_7 = arith.constant 0 : index
    %c0_8 = arith.constant 0 : index
    %c0_9 = arith.constant 0 : index
    %10 = vector.load %arg5[%c0_7, %c0_8, %c0_9] : memref<8x8x32xf32, #tpu.memory_space<vmem>>, vector<8x8x32xf32>
    %11 = vector.broadcast %9 : vector<8x1x32xf32> to vector<8x8x32xf32>
    %12 = arith.addf %11, %10 : vector<8x8x32xf32>
    %13 = math.tanh %12 : vector<8x8x32xf32>
    %c0_10 = arith.constant 0 : index
    %c0_11 = arith.constant 0 : index
    %14 = vector.load %arg8[%c0_10, %c0_11] : memref<1x32xf32, #tpu.memory_space<vmem>>, vector<1x32xf32>
    %15 = vector.shape_cast %14 : vector<1x32xf32> to vector<1x1x32xf32>
    %16 = vector.broadcast %15 : vector<1x1x32xf32> to vector<8x8x32xf32>
    %17 = arith.mulf %13, %16 : vector<8x8x32xf32>
    %cst_12 = arith.constant dense<0.000000e+00> : vector<8x8xf32>
    %18 = vector.multi_reduction <add>, %17, %cst_12 [2] : vector<8x8x32xf32> to vector<8x8xf32>
    %c0_13 = arith.constant 0 : index
    %c0_14 = arith.constant 0 : index
    %19 = vector.load %arg6[%c0_13, %c0_14] : memref<8x8xf32, #tpu.memory_space<vmem>>, vector<8x8xf32>
    %20 = arith.addf %18, %19 : vector<8x8xf32>
    %cst_15 = arith.constant dense<0xFF800000> : vector<8xf32>
    %21 = vector.multi_reduction <maximumf>, %20, %cst_15 [1] : vector<8x8xf32> to vector<8xf32>
    %22 = vector.shape_cast %21 : vector<8xf32> to vector<8x1xf32>
    %23 = vector.broadcast %22 : vector<8x1xf32> to vector<8x8xf32>
    %24 = arith.subf %20, %23 : vector<8x8xf32>
    %25 = math.exp %24 : vector<8x8xf32>
    %cst_16 = arith.constant dense<0.000000e+00> : vector<8xf32>
    %26 = vector.multi_reduction <add>, %25, %cst_16 [1] : vector<8x8xf32> to vector<8xf32>
    %27 = vector.shape_cast %26 : vector<8xf32> to vector<8x1xf32>
    %28 = tpu.reciprocal %27 {approx = true} : vector<8x1xf32> -> vector<8x1xf32>
    %29 = vector.broadcast %28 : vector<8x1xf32> to vector<8x8xf32>
    %30 = arith.mulf %25, %29 : vector<8x8xf32>
    %31 = vector.shape_cast %30 : vector<8x8xf32> to vector<8x8x1xf32>
    %c0_17 = arith.constant 0 : index
    %c0_18 = arith.constant 0 : index
    %c0_19 = arith.constant 0 : index
    %32 = vector.load %arg4[%c0_17, %c0_18, %c0_19] : memref<8x8x32xf32, #tpu.memory_space<vmem>>, vector<8x8x32xf32>
    %33 = vector.broadcast %31 : vector<8x8x1xf32> to vector<8x8x32xf32>
    %34 = arith.mulf %33, %32 : vector<8x8x32xf32>
    %cst_20 = arith.constant dense<0.000000e+00> : vector<8x32xf32>
    %35 = vector.multi_reduction <add>, %34, %cst_20 [1] : vector<8x8x32xf32> to vector<8x32xf32>
    %c0_21 = arith.constant 0 : index
    %c0_22 = arith.constant 0 : index
    %36 = vector.load %arg9[%c0_21, %c0_22] : memref<32x32xf32, #tpu.memory_space<vmem>>, vector<32x32xf32>
    %cst_23 = arith.constant dense<0.000000e+00> : vector<8x32xf32>
    %37 = tpu.matmul %4, %36, %cst_23 {dimension_numbers = #tpu.dot_dimension_numbers<[1], [0], [0], [1], [0, 0, 1, 1], [], []>} : vector<8x32xf32>, vector<32x32xf32>, vector<8x32xf32> -> vector<8x32xf32>
    %c0_24 = arith.constant 0 : index
    %c0_25 = arith.constant 0 : index
    %38 = vector.load %arg10[%c0_24, %c0_25] : memref<32x32xf32, #tpu.memory_space<vmem>>, vector<32x32xf32>
    %cst_26 = arith.constant dense<0.000000e+00> : vector<8x32xf32>
    %39 = tpu.matmul %35, %38, %cst_26 {dimension_numbers = #tpu.dot_dimension_numbers<[1], [0], [0], [1], [0, 0, 1, 1], [], []>} : vector<8x32xf32>, vector<32x32xf32>, vector<8x32xf32> -> vector<8x32xf32>
    %40 = arith.addf %37, %39 : vector<8x32xf32>
    %c0_27 = arith.constant 0 : index
    %c0_28 = arith.constant 0 : index
    %41 = vector.load %arg11[%c0_27, %c0_28] : memref<1x32xf32, #tpu.memory_space<vmem>>, vector<1x32xf32>
    %42 = vector.broadcast %41 : vector<1x32xf32> to vector<8x32xf32>
    %43 = arith.addf %40, %42 : vector<8x32xf32>
    %cst_29 = arith.constant 0.000000e+00 : f32
    %44 = vector.broadcast %cst_29 : f32 to vector<8x32xf32>
    %45 = arith.maximumf %43, %44 : vector<8x32xf32>
    %c0_30 = arith.constant 0 : index
    %c0_31 = arith.constant 0 : index
    %c0_32 = arith.constant 0 : index
    %46 = vector.load %arg19[%c0_30, %c0_31, %c0_32] : memref<2x8x32xf32, #tpu.memory_space<vmem>>, vector<1x8x32xf32>
    %47 = vector.shape_cast %46 : vector<1x8x32xf32> to vector<8x32xf32>
    %c0_33 = arith.constant 0 : index
    %c0_34 = arith.constant 0 : index
    %c0_35 = arith.constant 0 : index
    %48 = vector.load %arg20[%c0_33, %c0_34, %c0_35] : memref<2x8x32xf32, #tpu.memory_space<vmem>>, vector<1x8x32xf32>
    %49 = vector.shape_cast %48 : vector<1x8x32xf32> to vector<8x32xf32>
    %c0_36 = arith.constant 0 : index
    %c0_37 = arith.constant 0 : index
    %c0_38 = arith.constant 0 : index
    %50 = vector.load %arg12[%c0_36, %c0_37, %c0_38] : memref<2x32x128xf32, #tpu.memory_space<vmem>>, vector<1x32x128xf32>
    %51 = vector.shape_cast %50 : vector<1x32x128xf32> to vector<32x128xf32>
    %cst_39 = arith.constant dense<0.000000e+00> : vector<8x128xf32>
    %52 = tpu.matmul %45, %51, %cst_39 {dimension_numbers = #tpu.dot_dimension_numbers<[1], [0], [0], [1], [0, 0, 1, 1], [], []>} : vector<8x32xf32>, vector<32x128xf32>, vector<8x128xf32> -> vector<8x128xf32>
    %c0_40 = arith.constant 0 : index
    %c0_41 = arith.constant 0 : index
    %c0_42 = arith.constant 0 : index
    %53 = vector.load %arg13[%c0_40, %c0_41, %c0_42] : memref<2x32x128xf32, #tpu.memory_space<vmem>>, vector<1x32x128xf32>
    %54 = vector.shape_cast %53 : vector<1x32x128xf32> to vector<32x128xf32>
    %cst_43 = arith.constant dense<0.000000e+00> : vector<8x128xf32>
    %55 = tpu.matmul %47, %54, %cst_43 {dimension_numbers = #tpu.dot_dimension_numbers<[1], [0], [0], [1], [0, 0, 1, 1], [], []>} : vector<8x32xf32>, vector<32x128xf32>, vector<8x128xf32> -> vector<8x128xf32>
    %56 = arith.addf %52, %55 : vector<8x128xf32>
    %c0_44 = arith.constant 0 : index
    %c0_45 = arith.constant 0 : index
    %c0_46 = arith.constant 0 : index
    %57 = vector.load %arg14[%c0_44, %c0_45, %c0_46] : memref<2x1x128xf32, #tpu.memory_space<vmem>>, vector<1x1x128xf32>
    %58 = vector.shape_cast %57 : vector<1x1x128xf32> to vector<1x128xf32>
    %59 = vector.broadcast %58 : vector<1x128xf32> to vector<8x128xf32>
    %60 = arith.addf %56, %59 : vector<8x128xf32>
    %61 = arith.negf %60 : vector<8x128xf32>
    %62 = math.exp %61 : vector<8x128xf32>
    %cst_47 = arith.constant 1.000000e+00 : f32
    %63 = vector.broadcast %cst_47 : f32 to vector<8x128xf32>
    %64 = arith.addf %63, %62 : vector<8x128xf32>
    %65 = arith.divf %63, %64 : vector<8x128xf32>
    %66 = vector.extract_strided_slice %65 {offsets = [0, 0], sizes = [8, 32], strides = [1, 1]} : vector<8x128xf32> to vector<8x32xf32>
    %67 = vector.extract_strided_slice %65 {offsets = [0, 32], sizes = [8, 32], strides = [1, 1]} : vector<8x128xf32> to vector<8x32xf32>
    %68 = vector.extract_strided_slice %65 {offsets = [0, 64], sizes = [8, 32], strides = [1, 1]} : vector<8x128xf32> to vector<8x32xf32>
    %cst_48 = arith.constant 2.000000e+00 : f32
    %69 = vector.broadcast %cst_48 : f32 to vector<8x32xf32>
    %70 = arith.mulf %69, %68 : vector<8x32xf32>
    %cst_49 = arith.constant 1.000000e+00 : f32
    %71 = vector.broadcast %cst_49 : f32 to vector<8x32xf32>
    %72 = arith.subf %70, %71 : vector<8x32xf32>
    %73 = vector.extract_strided_slice %65 {offsets = [0, 96], sizes = [8, 32], strides = [1, 1]} : vector<8x128xf32> to vector<8x32xf32>
    %74 = arith.mulf %67, %49 : vector<8x32xf32>
    %75 = arith.mulf %66, %72 : vector<8x32xf32>
    %76 = arith.addf %74, %75 : vector<8x32xf32>
    %77 = math.tanh %76 : vector<8x32xf32>
    %78 = arith.mulf %73, %77 : vector<8x32xf32>
    %c0_50 = arith.constant 0 : index
    %c0_51 = arith.constant 0 : index
    %c0_52 = arith.constant 0 : index
    %79 = vector.load %arg19[%c0_50, %c0_51, %c0_52] : memref<2x8x32xf32, #tpu.memory_space<vmem>>, vector<1x8x32xf32>
    %80 = vector.shape_cast %79 : vector<1x8x32xf32> to vector<8x32xf32>
    %81 = vector.shape_cast %78 : vector<8x32xf32> to vector<1x8x32xf32>
    tpu.vector_store %arg19[%c0_50, %c0_51, %c0_52], %81 {strides = array<i32>} : memref<2x8x32xf32, #tpu.memory_space<vmem>>, vector<1x8x32xf32>,
    %c0_53 = arith.constant 0 : index
    %c0_54 = arith.constant 0 : index
    %c0_55 = arith.constant 0 : index
    %82 = vector.load %arg20[%c0_53, %c0_54, %c0_55] : memref<2x8x32xf32, #tpu.memory_space<vmem>>, vector<1x8x32xf32>
    %83 = vector.shape_cast %82 : vector<1x8x32xf32> to vector<8x32xf32>
    %84 = vector.shape_cast %76 : vector<8x32xf32> to vector<1x8x32xf32>
    tpu.vector_store %arg20[%c0_53, %c0_54, %c0_55], %84 {strides = array<i32>} : memref<2x8x32xf32, #tpu.memory_space<vmem>>, vector<1x8x32xf32>,
    %c1_56 = arith.constant 1 : index
    %c0_57 = arith.constant 0 : index
    %c0_58 = arith.constant 0 : index
    %85 = vector.load %arg19[%c1_56, %c0_57, %c0_58] : memref<2x8x32xf32, #tpu.memory_space<vmem>>, vector<1x8x32xf32>
    %86 = vector.shape_cast %85 : vector<1x8x32xf32> to vector<8x32xf32>
    %c1_59 = arith.constant 1 : index
    %c0_60 = arith.constant 0 : index
    %c0_61 = arith.constant 0 : index
    %87 = vector.load %arg20[%c1_59, %c0_60, %c0_61] : memref<2x8x32xf32, #tpu.memory_space<vmem>>, vector<1x8x32xf32>
    %88 = vector.shape_cast %87 : vector<1x8x32xf32> to vector<8x32xf32>
    %c1_62 = arith.constant 1 : index
    %c0_63 = arith.constant 0 : index
    %c0_64 = arith.constant 0 : index
    %89 = vector.load %arg12[%c1_62, %c0_63, %c0_64] : memref<2x32x128xf32, #tpu.memory_space<vmem>>, vector<1x32x128xf32>
    %90 = vector.shape_cast %89 : vector<1x32x128xf32> to vector<32x128xf32>
    %cst_65 = arith.constant dense<0.000000e+00> : vector<8x128xf32>
    %91 = tpu.matmul %78, %90, %cst_65 {dimension_numbers = #tpu.dot_dimension_numbers<[1], [0], [0], [1], [0, 0, 1, 1], [], []>} : vector<8x32xf32>, vector<32x128xf32>, vector<8x128xf32> -> vector<8x128xf32>
    %c1_66 = arith.constant 1 : index
    %c0_67 = arith.constant 0 : index
    %c0_68 = arith.constant 0 : index
    %92 = vector.load %arg13[%c1_66, %c0_67, %c0_68] : memref<2x32x128xf32, #tpu.memory_space<vmem>>, vector<1x32x128xf32>
    %93 = vector.shape_cast %92 : vector<1x32x128xf32> to vector<32x128xf32>
    %cst_69 = arith.constant dense<0.000000e+00> : vector<8x128xf32>
    %94 = tpu.matmul %86, %93, %cst_69 {dimension_numbers = #tpu.dot_dimension_numbers<[1], [0], [0], [1], [0, 0, 1, 1], [], []>} : vector<8x32xf32>, vector<32x128xf32>, vector<8x128xf32> -> vector<8x128xf32>
    %95 = arith.addf %91, %94 : vector<8x128xf32>
    %c1_70 = arith.constant 1 : index
    %c0_71 = arith.constant 0 : index
    %c0_72 = arith.constant 0 : index
    %96 = vector.load %arg14[%c1_70, %c0_71, %c0_72] : memref<2x1x128xf32, #tpu.memory_space<vmem>>, vector<1x1x128xf32>
    %97 = vector.shape_cast %96 : vector<1x1x128xf32> to vector<1x128xf32>
    %98 = vector.broadcast %97 : vector<1x128xf32> to vector<8x128xf32>
    %99 = arith.addf %95, %98 : vector<8x128xf32>
    %100 = arith.negf %99 : vector<8x128xf32>
    %101 = math.exp %100 : vector<8x128xf32>
    %cst_73 = arith.constant 1.000000e+00 : f32
    %102 = vector.broadcast %cst_73 : f32 to vector<8x128xf32>
    %103 = arith.addf %102, %101 : vector<8x128xf32>
    %104 = arith.divf %102, %103 : vector<8x128xf32>
    %105 = vector.extract_strided_slice %104 {offsets = [0, 0], sizes = [8, 32], strides = [1, 1]} : vector<8x128xf32> to vector<8x32xf32>
    %106 = vector.extract_strided_slice %104 {offsets = [0, 32], sizes = [8, 32], strides = [1, 1]} : vector<8x128xf32> to vector<8x32xf32>
    %107 = vector.extract_strided_slice %104 {offsets = [0, 64], sizes = [8, 32], strides = [1, 1]} : vector<8x128xf32> to vector<8x32xf32>
    %cst_74 = arith.constant 2.000000e+00 : f32
    %108 = vector.broadcast %cst_74 : f32 to vector<8x32xf32>
    %109 = arith.mulf %108, %107 : vector<8x32xf32>
    %cst_75 = arith.constant 1.000000e+00 : f32
    %110 = vector.broadcast %cst_75 : f32 to vector<8x32xf32>
    %111 = arith.subf %109, %110 : vector<8x32xf32>
    %112 = vector.extract_strided_slice %104 {offsets = [0, 96], sizes = [8, 32], strides = [1, 1]} : vector<8x128xf32> to vector<8x32xf32>
    %113 = arith.mulf %106, %88 : vector<8x32xf32>
    %114 = arith.mulf %105, %111 : vector<8x32xf32>
    %115 = arith.addf %113, %114 : vector<8x32xf32>
    %116 = math.tanh %115 : vector<8x32xf32>
    %117 = arith.mulf %112, %116 : vector<8x32xf32>
    %c1_76 = arith.constant 1 : index
    %c0_77 = arith.constant 0 : index
    %c0_78 = arith.constant 0 : index
    %118 = vector.load %arg19[%c1_76, %c0_77, %c0_78] : memref<2x8x32xf32, #tpu.memory_space<vmem>>, vector<1x8x32xf32>
    %119 = vector.shape_cast %118 : vector<1x8x32xf32> to vector<8x32xf32>
    %120 = vector.shape_cast %117 : vector<8x32xf32> to vector<1x8x32xf32>
    tpu.vector_store %arg19[%c1_76, %c0_77, %c0_78], %120 {strides = array<i32>} : memref<2x8x32xf32, #tpu.memory_space<vmem>>, vector<1x8x32xf32>,
    %c1_79 = arith.constant 1 : index
    %c0_80 = arith.constant 0 : index
    %c0_81 = arith.constant 0 : index
    %121 = vector.load %arg20[%c1_79, %c0_80, %c0_81] : memref<2x8x32xf32, #tpu.memory_space<vmem>>, vector<1x8x32xf32>
    %122 = vector.shape_cast %121 : vector<1x8x32xf32> to vector<8x32xf32>
    %123 = vector.shape_cast %115 : vector<8x32xf32> to vector<1x8x32xf32>
    tpu.vector_store %arg20[%c1_79, %c0_80, %c0_81], %123 {strides = array<i32>} : memref<2x8x32xf32, #tpu.memory_space<vmem>>, vector<1x8x32xf32>,
    %c0_82 = arith.constant 0 : index
    %c0_83 = arith.constant 0 : index
    %124 = vector.load %arg15[%c0_82, %c0_83] : memref<32x128xf32, #tpu.memory_space<vmem>>, vector<32x128xf32>
    %cst_84 = arith.constant dense<0.000000e+00> : vector<8x128xf32>
    %125 = tpu.matmul %117, %124, %cst_84 {dimension_numbers = #tpu.dot_dimension_numbers<[1], [0], [0], [1], [0, 0, 1, 1], [], []>} : vector<8x32xf32>, vector<32x128xf32>, vector<8x128xf32> -> vector<8x128xf32>
    %c0_85 = arith.constant 0 : index
    %c0_86 = arith.constant 0 : index
    %126 = vector.load %arg16[%c0_85, %c0_86] : memref<1x128xf32, #tpu.memory_space<vmem>>, vector<1x128xf32>
    %127 = vector.broadcast %126 : vector<1x128xf32> to vector<8x128xf32>
    %128 = arith.addf %125, %127 : vector<8x128xf32>
    %cst_87 = arith.constant dense<0xFF800000> : vector<8xf32>
    %129 = vector.multi_reduction <maximumf>, %128, %cst_87 [1] : vector<8x128xf32> to vector<8xf32>
    %130 = vector.shape_cast %129 : vector<8xf32> to vector<8x1xf32>
    %131 = vector.broadcast %130 : vector<8x1xf32> to vector<8x128xf32>
    %132 = arith.subf %128, %131 : vector<8x128xf32>
    %133 = math.exp %132 : vector<8x128xf32>
    %cst_88 = arith.constant dense<0.000000e+00> : vector<8xf32>
    %134 = vector.multi_reduction <add>, %133, %cst_88 [1] : vector<8x128xf32> to vector<8xf32>
    %135 = vector.shape_cast %134 : vector<8xf32> to vector<8x1xf32>
    %136 = math.log %135 : vector<8x1xf32>
    %137 = arith.addf %136, %130 : vector<8x1xf32>
    %138 = vector.broadcast %137 : vector<8x1xf32> to vector<8x128xf32>
    %139 = arith.subf %128, %138 : vector<8x128xf32>
    %c0_89 = arith.constant 0 : index
    %c0_90 = arith.constant 0 : index
    %c0_91 = arith.constant 0 : index
    %140 = vector.load %arg17[%c0_89, %c0_90, %c0_91] : memref<1x8x128xf32, #tpu.memory_space<vmem>>, vector<1x8x128xf32>
    %141 = vector.shape_cast %140 : vector<1x8x128xf32> to vector<8x128xf32>
    %142 = vector.shape_cast %139 : vector<8x128xf32> to vector<1x8x128xf32>
    tpu.vector_store %arg17[%c0_89, %c0_90, %c0_91], %142 {strides = array<i32>} : memref<1x8x128xf32, #tpu.memory_space<vmem>>, vector<1x8x128xf32>,
    %c3_i32 = arith.constant 3 : i32
    %143 = arith.cmpi eq, %arg0, %c3_i32 : i32
    %144 = arith.extui %143 : i1 to i32
    %c0_i32_92 = arith.constant 0 : i32
    %145 = arith.cmpi ne, %144, %c0_i32_92 : i32
    scf.if %145 {
      %c0_93 = arith.constant 0 : index
      %c0_94 = arith.constant 0 : index
      %c0_95 = arith.constant 0 : index
      %146 = vector.load %arg19[%c0_93, %c0_94, %c0_95] : memref<2x8x32xf32, #tpu.memory_space<vmem>>, vector<1x8x32xf32>
      %147 = vector.shape_cast %146 : vector<1x8x32xf32> to vector<8x32xf32>
      %c0_96 = arith.constant 0 : index
      %c0_97 = arith.constant 0 : index
      %c0_98 = arith.constant 0 : index
      %148 = vector.load %arg20[%c0_96, %c0_97, %c0_98] : memref<2x8x32xf32, #tpu.memory_space<vmem>>, vector<1x8x32xf32>
      %149 = vector.shape_cast %148 : vector<1x8x32xf32> to vector<8x32xf32>
      %c1_99 = arith.constant 1 : index
      %c0_100 = arith.constant 0 : index
      %c0_101 = arith.constant 0 : index
      %150 = vector.load %arg19[%c1_99, %c0_100, %c0_101] : memref<2x8x32xf32, #tpu.memory_space<vmem>>, vector<1x8x32xf32>
      %151 = vector.shape_cast %150 : vector<1x8x32xf32> to vector<8x32xf32>
      %c1_102 = arith.constant 1 : index
      %c0_103 = arith.constant 0 : index
      %c0_104 = arith.constant 0 : index
      %152 = vector.load %arg20[%c1_102, %c0_103, %c0_104] : memref<2x8x32xf32, #tpu.memory_space<vmem>>, vector<1x8x32xf32>
      %153 = vector.shape_cast %152 : vector<1x8x32xf32> to vector<8x32xf32>
      %154 = tpu.concatenate %147, %149, %151, %153 in 1 : vector<8x32xf32>, vector<8x32xf32>, vector<8x32xf32>, vector<8x32xf32> -> vector<8x128xf32>
      %c0_105 = arith.constant 0 : index
      %c0_106 = arith.constant 0 : index
      %155 = vector.load %arg18[%c0_105, %c0_106] : memref<8x128xf32, #tpu.memory_space<vmem>>, vector<8x128xf32>
      tpu.vector_store %arg18[%c0_105, %c0_106], %154 {strides = array<i32>} : memref<8x128xf32, #tpu.memory_space<vmem>>, vector<8x128xf32>,
    } else {
    }
    return
  }
  func.func @transform_0(%arg0: i32) -> (i32, i32, i32) {
    %c0_i32 = arith.constant 0 : i32
    %c0_i32_0 = arith.constant 0 : i32
    %c0_i32_1 = arith.constant 0 : i32
    return %arg0, %c0_i32, %c0_i32_0 : i32, i32, i32
  }
  func.func @transform_1(%arg0: i32) -> (i32, i32, i32) {
    %c0_i32 = arith.constant 0 : i32
    %c0_i32_0 = arith.constant 0 : i32
    %c0_i32_1 = arith.constant 0 : i32
    %c0_i32_2 = arith.constant 0 : i32
    return %c0_i32, %c0_i32_0, %c0_i32_1 : i32, i32, i32
  }
  func.func @transform_2(%arg0: i32) -> (i32, i32, i32) {
    %c0_i32 = arith.constant 0 : i32
    %c0_i32_0 = arith.constant 0 : i32
    %c0_i32_1 = arith.constant 0 : i32
    %c0_i32_2 = arith.constant 0 : i32
    return %c0_i32, %c0_i32_0, %c0_i32_1 : i32, i32, i32
  }
  func.func @transform_3(%arg0: i32) -> (i32, i32, i32) {
    %c0_i32 = arith.constant 0 : i32
    %c0_i32_0 = arith.constant 0 : i32
    %c0_i32_1 = arith.constant 0 : i32
    %c0_i32_2 = arith.constant 0 : i32
    return %c0_i32, %c0_i32_0, %c0_i32_1 : i32, i32, i32
  }
  func.func @transform_4(%arg0: i32) -> (i32, i32, i32) {
    %c0_i32 = arith.constant 0 : i32
    %c0_i32_0 = arith.constant 0 : i32
    %c0_i32_1 = arith.constant 0 : i32
    %c0_i32_2 = arith.constant 0 : i32
    return %c0_i32, %c0_i32_0, %c0_i32_1 : i32, i32, i32
  }
  func.func @transform_5(%arg0: i32) -> (i32, i32) {
    %c0_i32 = arith.constant 0 : i32
    %c0_i32_0 = arith.constant 0 : i32
    %c0_i32_1 = arith.constant 0 : i32
    return %c0_i32, %c0_i32_0 : i32, i32
  }
  func.func @transform_6(%arg0: i32) -> (i32, i32) {
    %c0_i32 = arith.constant 0 : i32
    %c0_i32_0 = arith.constant 0 : i32
    %c0_i32_1 = arith.constant 0 : i32
    return %c0_i32, %c0_i32_0 : i32, i32
  }
  func.func @transform_7(%arg0: i32) -> (i32, i32) {
    %c0_i32 = arith.constant 0 : i32
    %c0_i32_0 = arith.constant 0 : i32
    %c0_i32_1 = arith.constant 0 : i32
    return %c0_i32, %c0_i32_0 : i32, i32
  }
  func.func @transform_8(%arg0: i32) -> (i32, i32) {
    %c0_i32 = arith.constant 0 : i32
    %c0_i32_0 = arith.constant 0 : i32
    %c0_i32_1 = arith.constant 0 : i32
    return %c0_i32, %c0_i32_0 : i32, i32
  }
  func.func @transform_9(%arg0: i32) -> (i32, i32) {
    %c0_i32 = arith.constant 0 : i32
    %c0_i32_0 = arith.constant 0 : i32
    %c0_i32_1 = arith.constant 0 : i32
    return %c0_i32, %c0_i32_0 : i32, i32
  }
  func.func @transform_10(%arg0: i32) -> (i32, i32) {
    %c0_i32 = arith.constant 0 : i32
    %c0_i32_0 = arith.constant 0 : i32
    %c0_i32_1 = arith.constant 0 : i32
    return %c0_i32, %c0_i32_0 : i32, i32
  }
  func.func @transform_11(%arg0: i32) -> (i32, i32, i32) {
    %c0_i32 = arith.constant 0 : i32
    %c0_i32_0 = arith.constant 0 : i32
    %c0_i32_1 = arith.constant 0 : i32
    %c0_i32_2 = arith.constant 0 : i32
    return %c0_i32, %c0_i32_0, %c0_i32_1 : i32, i32, i32
  }
  func.func @transform_12(%arg0: i32) -> (i32, i32, i32) {
    %c0_i32 = arith.constant 0 : i32
    %c0_i32_0 = arith.constant 0 : i32
    %c0_i32_1 = arith.constant 0 : i32
    %c0_i32_2 = arith.constant 0 : i32
    return %c0_i32, %c0_i32_0, %c0_i32_1 : i32, i32, i32
  }
  func.func @transform_13(%arg0: i32) -> (i32, i32, i32) {
    %c0_i32 = arith.constant 0 : i32
    %c0_i32_0 = arith.constant 0 : i32
    %c0_i32_1 = arith.constant 0 : i32
    %c0_i32_2 = arith.constant 0 : i32
    return %c0_i32, %c0_i32_0, %c0_i32_1 : i32, i32, i32
  }
  func.func @transform_14(%arg0: i32) -> (i32, i32) {
    %c0_i32 = arith.constant 0 : i32
    %c0_i32_0 = arith.constant 0 : i32
    %c0_i32_1 = arith.constant 0 : i32
    return %c0_i32, %c0_i32_0 : i32, i32
  }
  func.func @transform_15(%arg0: i32) -> (i32, i32) {
    %c0_i32 = arith.constant 0 : i32
    %c0_i32_0 = arith.constant 0 : i32
    %c0_i32_1 = arith.constant 0 : i32
    return %c0_i32, %c0_i32_0 : i32, i32
  }
  func.func @transform_16(%arg0: i32) -> (i32, i32, i32) {
    %c0_i32 = arith.constant 0 : i32
    %c0_i32_0 = arith.constant 0 : i32
    %c0_i32_1 = arith.constant 0 : i32
    return %arg0, %c0_i32, %c0_i32_0 : i32, i32, i32
  }
  func.func @transform_17(%arg0: i32) -> (i32, i32) {
    %c0_i32 = arith.constant 0 : i32
    %c0_i32_0 = arith.constant 0 : i32
    %c0_i32_1 = arith.constant 0 : i32
    return %c0_i32, %c0_i32_0 : i32, i32
  }
}

</mosaic_0001>

<bundles_post_ra>
// kernel: _decode_steps.1
= control target key start
LH: loop header
LB: loop body
LE: loop exit
PB: predicated region body
PF: predicated region fallthrough
CT: control target
= control target key end

     0   :  { %s2359_s24 = smov 0   ;;  %s2793_s0 = inlined_call_operand.vmem [shape: f32[4,8,32], index: 0, kind: input, shape index: {}]   ;;  %s2794_s1 = inlined_call_operand.vmem [shape: f32[2,8,32], index: 1, kind: input, shape index: {}]   ;;  %s2795_s2 = inlined_call_operand.vmem [shape: f32[2,8,32], index: 2, kind: input, shape index: {}]   ;;  %s2796_s3 = inlined_call_operand.vmem [shape: f32[8,8,32], index: 3, kind: input, shape index: {}]   ;;  %s2797_s4 = inlined_call_operand.vmem [shape: f32[8,8,32], index: 4, kind: input, shape index: {}]   ;;  %s2798_s5 = inlined_call_operand.vmem [shape: f32[8,8], index: 5, kind: input, shape index: {}]   ;;  %s2799_s6 = inlined_call_operand.vmem [shape: f32[32,32], index: 6, kind: input, shape index: {}]   ;;  %s2800_s7 = inlined_call_operand.vmem [shape: f32[1,32], index: 7, kind: input, shape index: {}]   ;;  %s2801_s8 = inlined_call_operand.vmem [shape: f32[32,32], index: 8, kind: input, shape index: {}]   ;;  %s2802_s9 = inlined_call_operand.vmem [shape: f32[32,32], index: 9, kind: input, shape index: {}]   ;;  %s2803_s10 = inlined_call_operand.vmem [shape: f32[1,32], index: 10, kind: input, shape index: {}]   ;;  %s2804_s11 = inlined_call_operand.vmem [shape: f32[2,32,128], index: 11, kind: input, shape index: {}]   ;;  %s2805_s12 = inlined_call_operand.vmem [shape: f32[2,32,128], index: 12, kind: input, shape index: {}]   ;;  %s2806_s13 = inlined_call_operand.vmem [shape: f32[2,1,128], index: 13, kind: input, shape index: {}]   ;;  %s2807_s14 = inlined_call_operand.vmem [shape: f32[32,128], index: 14, kind: input, shape index: {}]   ;;  %s2808_s15 = inlined_call_operand.vmem [shape: f32[1,128], index: 15, kind: input, shape index: {}]   ;;  %s2809_s16 = inlined_call_operand.vmem [shape: f32[4,8,128], index: 16, kind: output, shape index: {0}]   ;;  %s2810_s17 = inlined_call_operand.vmem [shape: f32[8,128], index: 17, kind: output, shape index: {1}]  }
   0x1   :  { %2812 = sst [smem:[#allocation4_spill]] %s2793_s0 }
   0x2   :  { %2813 = sst [smem:[#allocation5_spill]] %s2794_s1 }
   0x3 LB: > { %s2365_s25 = sadd.s32 4294967295, %s2257_s24   ;;  %p2020_p0 = scmp.ge.s32.totalorder %s2257_s24, 1  ;;  %s2257_s24 = sphi %s2359_s24, %s28_s24  }
   0x4   : > { %p484_p1 = scmp.lt.s32.totalorder %s2257_s24, 5 }
   0x6   : > { %p485_p2 = pnand %p2020_p0, %p484_p1 }
   0x7   : > { %p534_p3 = scmp.lt.s32.totalorder (!%p485_p2), %s2365_s25, 3  ;;  %s2814_s0 = sld [smem:[#allocation4_spill]] (!%p485_p2) }
   0x8   : > { %488 = sbr.rel (%p485_p2) target bundleno = 3429 (0xd65), region = 84  ;;  %p2023_p4 = scmp.ne.s32.totalorder (!%p485_p2), %s2365_s25, 0 }
   0xd   : > { %s535_s26 = scalar_select %p534_p3, %s2365_s25, 3 }
   0xe   : > { %545 = sbr.rel (%p2023_p4) target bundleno = 22 (0x16), region = 88  ;;  %s2815_s22 = sld [smem:[#allocation5_spill]] (!%p2023_p4) }
   0xf   : > { %s2021_s27 = sshll.u32 %s535_s26, 3 }
  0x10   : > { %s2374_s30 = scalar_lea.vmem %s2814_s0, %s2021_s27  ;;  %s2379_s1 = scalar_lea.vmem %s2809_s16, %s2021_s27 }
  0x13   : > { %vm548_vm0 = vcmask 261120   ;;  %v551_v2 = vld [vmem:[%s2795_s2] sm:$0xff]  ;;  %v552_v3 = vld [vmem:[%s2795_s2 + $0x8] sm:$0xff] }
  0x14   : > { %v546_v0 = vld [vmem:[%s2815_s22] sm:$0xff]  ;;  %v547_v1 = vld [vmem:[%s2815_s22 + $0x8] sm:$0xff]  ;;  %553 = vst.msk [vmem:[#allocation3] sm:$0xff] %vm548_vm0, %v551_v2  ;;  %554 = vst.msk [vmem:[#allocation3 + $0x8] sm:$0xff] %vm548_vm0, %v552_v3 }
  0x15   : > { %549 = vst.msk [vmem:[#allocation2] sm:$0xff] %vm548_vm0, %v546_v0  ;;  %550 = vst.msk [vmem:[#allocation2 + $0x8] sm:$0xff] %vm548_vm0, %v547_v1 }
  0x16 PF: > { %v561_v4 = vld [vmem:[%s2799_s6 + $0x18] sm:$0xff]  ;;  %v641_v5 = vlaneseq  ;;  %v2259_v6 = vmov 0.0   ;;  %v560_v7 = vld [vmem:[%s2799_s6 + $0x10] sm:$0xff]  ;;  %vm2260_vm1 = vmmov 0   ;;  %v559_v9 = vld [vmem:[%s2799_s6 + $0x8] sm:$0xff]  ;;  %vm562_vm2 = vcmask 261120  }
  0x17   : > { %2093 = vmatprep.subr.mxu0 %v2259_v6  ;;  %2101 = vmatprep.mubr.msk.f32.mxu0 %vm2260_vm1, %v2259_v6  ;;  %v2414_v10 = vld [vmem:[%s2798_s5] sm:$0xff]  ;;  %v2261_v25 = vmov 1966171168   ;;  %v687_v45 = vld [vmem:[%s2797_s4 + $0x8] sm:$0xff]  ;;  %v688_v46 = vld [vmem:[%s2797_s4 + $0x10] sm:$0xff]  ;;  %vm929_vm3 = vcmask 1041409  }
  0x18   : > { %2094 = vmatpush3.msra.mxu0 %v561_v4  ;;  %v2404_v8 = vshrl.u32 %v641_v5, 7  ;;  %2104 = vmatprep.subr.mxu1 %v2259_v6  ;;  %v558_v13 = vld [vmem:[%s2799_s6] sm:$0xff]  ;;  %v639_v26 = vunpack.c.l.s4 %v2261_v25  ;;  %v689_v48 = vld [vmem:[%s2797_s4 + $0x18] sm:$0xff]  ;;  %v691_v56 = vld [vmem:[%s2797_s4 + $0x28] sm:$0xff]  ;;  %vm931_vm4 = vcmask 1042434   ;;  %vm933_vm5 = vcmask 1043459  }
  0x19   : > { %2095 = vmatprep.subr.mxu0 %v2259_v6  ;;  %2112 = vmatprep.mubr.msk.f32.mxu1 %vm2260_vm1, %v2259_v6  ;;  %v686_v40 = vld [vmem:[%s2797_s4] sm:$0xff]  ;;  %v692_v60 = vld [vmem:[%s2797_s4 + $0x30] sm:$0xff]  ;;  %v693_v1 = vld [vmem:[%s2797_s4 + $0x38] sm:$0xff]  ;;  %vm935_vm6 = vcmask 1044484   ;;  %vm937_vm7 = vcmask 1045509   ;;  %vm939_vm8 = vcmask 1046534  }
  0x1a   : > { %2096 = vmatpush3.msra.mxu0 %v560_v7  ;;  %v2419_v11 = vsub.s32 1, %v2404_v8  ;;  %v2422_v12 = vsub.s32 2, %v2404_v8  ;;  %v2429_v14 = vsub.s32 0, %v2404_v8  ;;  %v2432_v15 = vsub.s32 4, %v2404_v8  ;;  %v690_v49 = vld [vmem:[%s2797_s4 + $0x20] sm:$0xff]  ;;  %s2263_s28 = smov 64  }
  0x1b   : > { %2097 = vmatprep.subr.mxu0 %v2259_v6  ;;  %v2444_v20 = vsub.s32 3, %v2404_v8  ;;  %v2456_v23 = vsub.s32 5, %v2404_v8  ;;  %v640_v27 = vunpack.c.0.s8 %v639_v26  ;;  %v2025_v4 = vld [vmem:[%s2800_s7] ss:$0 sm:$0xff]  ;;  %vm941_vm9 = vcmask 1047559   ;;  %s2264_s29 = smov 32  }
  0x1c   : > { %2098 = vmatpush3.msra.mxu0 %v559_v9  ;;  %v2434_v16 = vld [vmem:[#allocation2 + $0x8] sm:$0xff]  ;;  %v801_v17 = vrot.slane %v2414_v10, %v2419_v11  ;;  %v794_v18 = vrot.slane %v2414_v10, %v2429_v14  ;;  %v808_v19 = vrot.slane %v2414_v10, %v2422_v12  ;;  %v822_v21 = vrot.slane %v2414_v10, %v2432_v15  ;;  %s2265_s0 = smov 96   ;;  %p2050_p5 = scmp.ne.s32.totalorder %s2365_s25, 3 }
  0x1d   : > { %2099 = vmatprep.subr.mxu0 %v2259_v6  ;;  %v815_v22 = vrot.slane %v2414_v10, %v2444_v20  ;;  %v829_v24 = vrot.slane %v2414_v10, %v2456_v23  ;;  %v643_v28 = vsub.s32 %v640_v27, %v2404_v8  ;;  %vm944_vm10 = vcmask 64512   ;;  %s2268_s18 = smov (!%p2050_p5), 64  }
  0x1e   : > { %2100 = vmatpush3.msra.mxu0 %v558_v13  ;;  %803 = vbcast.lane.b32.xlu1 %v801_v17, 256 }
  0x1f   : > { %2102 = vmatmul.mubr.msk.f32.vlgmr.msra.gmra.mxu0 %vm562_vm2, %v2434_v16  ;;  %796 = vbcast.lane.b32.xlu0 %v794_v18, 256 }
  0x20   : > { %2115 = vmatprep.subr.mxu0 %v2259_v6  ;;  %2123 = vmatprep.mubr.msk.f32.mxu0 %vm2260_vm1, %v2259_v6 }
  0x22   : > { %810 = vbcast.lane.b32.xlu1 %v808_v19, 256 }
  0x23   : > { %824 = vbcast.lane.b32.xlu0 %v822_v21, 256 }
  0x26   : > { %817 = vbcast.lane.b32.xlu1 %v815_v22, 256 }
  0x2a   : > { %831 = vbcast.lane.b32.xlu1 %v829_v24, 256 }
  0xdf   : > { %v632_v29 = vpop.f32.mrf.mxu0 }
  0xe0   : > { %v637_v30 = vcombine.high %v632_v29, %v632_v29  ;;  %v644_v31 = vrot.slane %v632_v29, %v643_v28 }
  0xe1   : > { %v2103_v32 = vpop.f32.mrf.mxu0 }
  0xe2   : > { %v651_v33 = vrot.slane %v637_v30, %v643_v28  ;;  %v652_v34 = vcombine.high %v644_v31, %v644_v31  ;;  %v660_v35 = vrot.slane %v644_v31, %v643_v28 }
  0xe4   : > { %v653_v36 = vcombine.high %v651_v33, %v651_v33  ;;  %v667_v37 = vrot.slane %v651_v33, %v643_v28  ;;  %v674_v38 = vrot.slane %v652_v34, %v643_v28  ;;  %v682_v39 = vcombine.high %v660_v35, %v660_v35 }
  0xe5   : > { %v697_v41 = vrot.slane %v660_v35, %v2429_v14 }
  0xe6   : > { %v681_v42 = vrot.slane %v653_v36, %v643_v28  ;;  %v683_v43 = vcombine.high %v667_v37, %v667_v37  ;;  %v684_v44 = vcombine.high %v674_v38, %v674_v38  ;;  %v701_v47 = vrot.slane %v674_v38, %v2429_v14 }
  0xe7   : > { %v705_v50 = vrot.slane %v682_v39, %v2429_v14  ;;  %v713_v51 = vrot.slane %v667_v37, %v2429_v14  ;;  %v734_v52 = vadd.f32 %v697_v41, %v686_v40  ;;  %v2262_v39 = vmov 0  }
  0xe8   : > { %v685_v53 = vcombine.high %v681_v42, %v681_v42  ;;  %v709_v54 = vrot.slane %v684_v44, %v2429_v14  ;;  %v717_v55 = vrot.slane %v681_v42, %v2429_v14  ;;  %v721_v57 = vrot.slane %v683_v43, %v2429_v14  ;;  %2199 = vset.pattern.permute.xlu0 %v2262_v39 }
  0xe9   : > { %v735_v58 = vadd.f32 %v701_v47, %v687_v45  ;;  %v736_v59 = vadd.f32 %v705_v50, %v688_v46  ;;  %2201 = vtanh.f32 %v734_v52  ;;  %v738_v62 = vadd.f32 %v713_v51, %v690_v49  ;;  %2200 = vset.pattern.permute.xlu1 %v2262_v39  ;;  %v804_v45 = vpop.permute.xlu1 %803  ;;  %v797_v47 = vpop.permute.xlu0 %796 }
  0xea   : > { %v737_v61 = vadd.f32 %v709_v54, %v689_v48  ;;  %v725_v63 = vrot.slane %v685_v53, %v2429_v14  ;;  %v739_v0 = vadd.f32 %v717_v55, %v691_v56  ;;  %v740_v2 = vadd.f32 %v721_v57, %v692_v60 }
  0xeb   : > { %2203 = vtanh.f32 %v735_v58  ;;  %v2505_v41 = vsub.s32 7, %v2404_v8  ;;  %v2508_v42 = vsub.s32 6, %v2404_v8 }
  0xec   : > { %2205 = vtanh.f32 %v736_v59  ;;  %v741_v3 = vadd.f32 %v725_v63, %v693_v1 }
  0xed   : > { %2207 = vtanh.f32 %v737_v61  ;;  %v843_v43 = vrot.slane %v2414_v10, %v2505_v41  ;;  %v836_v44 = vrot.slane %v2414_v10, %v2508_v42  ;;  %v811_v46 = vpop.permute.xlu1 %810  ;;  %v825_v49 = vpop.permute.xlu0 %824 }
  0xee   : > { %2209 = vtanh.f32 %v738_v62 }
  0xef   : > { %2211 = vtanh.f32 %v739_v0 }
  0xf0   : > { %2213 = vtanh.f32 %v740_v2 }
  0xf1   : > { %2215 = vtanh.f32 %v741_v3  ;;  %v818_v48 = vpop.permute.xlu1 %817 }
  0xf5   : > { %v832_v50 = vpop.permute.xlu1 %831 }
  0xf6   : > { %v2202_v7 = vpop.eup %2201 }
  0xf7   : > { %v757_v9 = vmul.f32 %v2202_v7, %v2025_v4 }
  0xf8   : > { %v2204_v13 = vpop.eup %2203 }
  0xf9   : > { %v2206_v17 = vpop.eup %2205  ;;  %v765_v18 = vsel %vm562_vm2, %v757_v9, 0.0  ;;  %v758_v19 = vmul.f32 %v2204_v13, %v2025_v4 }
  0xfa   : > { %v2208_v21 = vpop.eup %2207  ;;  %766 = vadd.xlane.f32.xlu0 %v765_v18  ;;  %v759_v22 = vmul.f32 %v2206_v17, %v2025_v4 }
  0xfb   : > { %v2210_v24 = vpop.eup %2209  ;;  %v760_v26 = vmul.f32 %v2208_v21, %v2025_v4  ;;  %v768_v28 = vsel %vm562_vm2, %v758_v19, 0.0 }
  0xfc   : > { %v771_v25 = vsel %vm562_vm2, %v759_v22, 0.0  ;;  %v2212_v27 = vpop.eup %2211  ;;  %v761_v29 = vmul.f32 %v2210_v24, %v2025_v4 }
  0xfd   : > { %772 = vadd.xlane.f32.xlu1 %v771_v25  ;;  %v2214_v30 = vpop.eup %2213  ;;  %v774_v31 = vsel %vm562_vm2, %v760_v26, 0.0  ;;  %v762_v32 = vmul.f32 %v2212_v27, %v2025_v4 }
  0xfe   : > { %769 = vadd.xlane.f32.xlu0 %v768_v28  ;;  %v2216_v33 = vpop.eup %2215  ;;  %v777_v34 = vsel %vm562_vm2, %v761_v29, 0.0  ;;  %v763_v35 = vmul.f32 %v2214_v30, %v2025_v4 }
  0xff   : > { %v780_v36 = vsel %vm562_vm2, %v762_v32, 0.0  ;;  %v764_v37 = vmul.f32 %v2216_v33, %v2025_v4  ;;  %v896_v4 = vand.u32 127, %v641_v5 }
 0x100   : > { %v783_v38 = vsel %vm562_vm2, %v763_v35, 0.0 }
 0x101   : > { %775 = vadd.xlane.f32.xlu1 %v774_v31  ;;  %v786_v40 = vsel %vm562_vm2, %v764_v37, 0.0  ;;  %v2531_v9 = vsub.s32 %v896_v4, %v2404_v8 }
 0x102   : > { %778 = vadd.xlane.f32.xlu0 %v777_v34 }
 0x105   : > { %781 = vadd.xlane.f32.xlu1 %v780_v36 }
 0x106   : > { %784 = vadd.xlane.f32.xlu0 %v783_v38 }
 0x109   : > { %787 = vadd.xlane.f32.xlu1 %v786_v40 }
 0x11a   : > { %845 = vbcast.lane.b32.xlu1 %v843_v43, 256 }
 0x11c   : > { %838 = vbcast.lane.b32.xlu0 %v836_v44, 256 }
 0x183   : > { %v767_v51 = vpop.xlane.xlu0 %766 }
 0x184   : > { %v2514_v52 = vadd.f32 %v797_v47, %v767_v51 }
 0x186   : > { %v773_v53 = vpop.xlane.xlu1 %772  ;;  %872 = vperm.xlu0 %2199, %v2514_v52  }
 0x187   : > { %v770_v54 = vpop.xlane.xlu0 %769  ;;  %v857_v58 = vadd.f32 %v811_v46, %v773_v53 }
 0x188   : > { %v856_v55 = vadd.f32 %v804_v45, %v770_v54 }
 0x18a   : > { %v776_v56 = vpop.xlane.xlu1 %775  ;;  %875 = vperm.xlu1 %2200, %v856_v55  }
 0x18b   : > { %v2517_v57 = vadd.f32 %v818_v48, %v776_v56  ;;  %v779_v10 = vpop.xlane.xlu0 %778 }
 0x18c   : > { %v859_v62 = vadd.f32 %v825_v49, %v779_v10 }
 0x18d   : > { %881 = vperm.xlu0 %2199, %v2517_v57  }
 0x18e   : > { %v782_v59 = vpop.xlane.xlu1 %781  ;;  %878 = vperm.xlu1 %2200, %v857_v58  }
 0x18f   : > { %v2520_v60 = vadd.f32 %v832_v50, %v782_v59  ;;  %v785_v61 = vpop.xlane.xlu0 %784 }
 0x191   : > { %887 = vperm.xlu0 %2199, %v2520_v60  }
 0x192   : > { %v788_v63 = vpop.xlane.xlu1 %787  ;;  %884 = vperm.xlu1 %2200, %v859_v62  }
 0x193   : > { %v839_v0 = vpop.permute.xlu0 %838 }
 0x194   : > { %v2523_v1 = vadd.f32 %v839_v0, %v785_v61 }
 0x196   : > { %v846_v2 = vpop.permute.xlu1 %845  ;;  %890 = vperm.xlu1 %2200, %v2523_v1  }
 0x197   : > { %v2526_v3 = vadd.f32 %v846_v2, %v788_v63 }
 0x199   : > { %893 = vperm.xlu0 %2199, %v2526_v3  }
 0x201   : > { %v873_v7 = vpop.permute.xlu0 %872 }
 0x202   : > { %v900_v19 = vrot.slane %v873_v7, %v2531_v9 }
 0x205   : > { %v876_v13 = vpop.permute.xlu1 %875 }
 0x206   : > { %v904_v17 = vrot.slane %v876_v13, %v2531_v9 }
 0x208   : > { %v882_v18 = vpop.permute.xlu0 %881  ;;  %v930_v24 = vsel %vm929_vm3, %v904_v17, %v900_v19 }
 0x209   : > { %v879_v21 = vpop.permute.xlu1 %878  ;;  %v912_v5 = vrot.slane %v882_v18, %v2531_v9 }
 0x20a   : > { %v908_v22 = vrot.slane %v879_v21, %v2531_v9 }
 0x20c   : > { %v932_v25 = vsel %vm931_vm4, %v908_v22, %v930_v24  ;;  %v888_v26 = vpop.permute.xlu0 %887 }
 0x20d   : > { %v885_v8 = vpop.permute.xlu1 %884  ;;  %v934_v28 = vsel %vm933_vm5, %v912_v5, %v932_v25  ;;  %v920_v30 = vrot.slane %v888_v26, %v2531_v9 }
 0x20e   : > { %v916_v27 = vrot.slane %v885_v8, %v2531_v9 }
 0x210   : > { %v936_v29 = vsel %vm935_vm6, %v916_v27, %v934_v28 }
 0x211   : > { %v891_v31 = vpop.permute.xlu1 %890  ;;  %v938_v33 = vsel %vm937_vm7, %v920_v30, %v936_v29 }
 0x212   : > { %v924_v32 = vrot.slane %v891_v31, %v2531_v9 }
 0x214   : > { %v894_v34 = vpop.permute.xlu0 %893  ;;  %v940_v35 = vsel %vm939_vm8, %v924_v32, %v938_v33 }
 0x215   : > { %v928_v36 = vrot.slane %v894_v34, %v2531_v9 }
 0x217   : > { %v942_v37 = vsel %vm941_vm9, %v928_v36, %v940_v35 }
 0x218   : > { %v945_v38 = vsel %vm944_vm10, %v942_v37, -inf }
 0x219   : > { %946 = vmax.xlane.f32.xlu1 %v945_v38 }
 0x2a2   : > { %v947_v39 = vpop.xlane.xlu1 %946 }
 0x2a3   : > { %v952_v40 = vrot.slane %v947_v39, %v2429_v14  ;;  %v956_v43 = vrot.slane %v947_v39, %v2419_v11  ;;  %v960_v44 = vrot.slane %v947_v39, %v2422_v12  ;;  %v964_v48 = vrot.slane %v947_v39, %v2444_v20 }
 0x2a4   : > { %v968_v51 = vrot.slane %v947_v39, %v2432_v15  ;;  %v972_v56 = vrot.slane %v947_v39, %v2456_v23  ;;  %v980_v63 = vrot.slane %v947_v39, %v2505_v41 }
 0x2a5   : > { %v989_v45 = vsub.f32 %v2514_v52, %v952_v40  ;;  %v990_v46 = vsub.f32 %v856_v55, %v956_v43  ;;  %v991_v49 = vsub.f32 %v857_v58, %v960_v44  ;;  %v992_v53 = vsub.f32 %v2517_v57, %v964_v48 }
 0x2a6   : > { %v993_v10 = vsub.f32 %v859_v62, %v968_v51  ;;  %v976_v52 = vrot.slane %v947_v39, %v2508_v42  ;;  %v994_v55 = vsub.f32 %v2520_v60, %v972_v56  ;;  %v996_v62 = vsub.f32 %v2526_v3, %v980_v63  ;;  %v1254_v63 = vld [vmem:[%s2802_s9] sm:$0xff] }
 0x2a7   : > { %v997_v47 = vmul.f32 1.442695, %v989_v45  ;;  %v999_v50 = vmul.f32 1.442695, %v990_v46  ;;  %v1001_v54 = vmul.f32 1.442695, %v991_v49 }
 0x2a8   : > { %v1003_v59 = vmul.f32 1.442695, %v992_v53  ;;  %v1005_v61 = vmul.f32 1.442695, %v993_v10  ;;  %v995_v0 = vsub.f32 %v2523_v1, %v976_v52  ;;  %v1007_v57 = vmul.f32 1.442695, %v994_v55 }
 0x2a9   : > { %2217 = vpow2.f32 %v997_v47  ;;  %v1011_v60 = vmul.f32 1.442695, %v996_v62 }
 0x2aa   : > { %2219 = vpow2.f32 %v999_v50  ;;  %v1009_v4 = vmul.f32 1.442695, %v995_v0  ;;  %v555_v0 = vld [vmem:[%s2374_s30] sm:$0xff] }
 0x2ab   : > { %2221 = vpow2.f32 %v1001_v54 }
 0x2ac   : > { %2223 = vpow2.f32 %v1003_v59 }
 0x2ad   : > { %2225 = vpow2.f32 %v1005_v61  ;;  %v1255_v61 = vld [vmem:[%s2802_s9 + $0x8] sm:$0xff] }
 0x2ae   : > { %2227 = vpow2.f32 %v1007_v57  ;;  %v1138_v57 = vld [vmem:[%s2796_s3] sm:$0xff] }
 0x2af   : > { %2229 = vpow2.f32 %v1009_v4  ;;  %v1139_v4 = vld [vmem:[%s2796_s3 + $0x8] sm:$0xff] }
 0x2b0   : > { %2231 = vpow2.f32 %v1011_v60  ;;  %v1142_v60 = vld [vmem:[%s2796_s3 + $0x20] sm:$0xff] }
 0x2b6   : > { %v2218_v58 = vpop.eup %2217 }
 0x2b7   : > { %1022 = vperm.xlu0 %2199, %v2218_v58   ;;  %v2220_v2 = vpop.eup %2219 }
 0x2b8   : > { %v2222_v7 = vpop.eup %2221 }
 0x2b9   : > { %v2224_v13 = vpop.eup %2223 }
 0x2ba   : > { %v2226_v17 = vpop.eup %2225 }
 0x2bb   : > { %1025 = vperm.xlu0 %2199, %v2220_v2   ;;  %v2228_v18 = vpop.eup %2227 }
 0x2bc   : > { %v2230_v1 = vpop.eup %2229 }
 0x2bd   : > { %v2232_v19 = vpop.eup %2231 }
 0x2bf   : > { %1028 = vperm.xlu0 %2199, %v2222_v7  }
 0x2c3   : > { %1031 = vperm.xlu0 %2199, %v2224_v13  }
 0x2c7   : > { %1034 = vperm.xlu0 %2199, %v2226_v17  }
 0x2cb   : > { %1037 = vperm.xlu0 %2199, %v2228_v18  }
 0x2cf   : > { %1040 = vperm.xlu0 %2199, %v2230_v1  }
 0x2d3   : > { %1043 = vperm.xlu0 %2199, %v2232_v19  }
 0x332   : > { %v1023_v21 = vpop.permute.xlu0 %1022 }
 0x333   : > { %v1048_v27 = vrot.slane %v1023_v21, %v2531_v9 }
 0x336   : > { %v1026_v22 = vpop.permute.xlu0 %1025 }
 0x337   : > { %v1052_v8 = vrot.slane %v1026_v22, %v2531_v9 }
 0x339   : > { %v1077_v31 = vsel %vm929_vm3, %v1052_v8, %v1048_v27 }
 0x33a   : > { %v1029_v3 = vpop.permute.xlu0 %1028 }
 0x33b   : > { %v1056_v26 = vrot.slane %v1029_v3, %v2531_v9 }
 0x33d   : > { %v1078_v33 = vsel %vm931_vm4, %v1056_v26, %v1077_v31 }
 0x33e   : > { %v1032_v24 = vpop.permute.xlu0 %1031 }
 0x33f   : > { %v1060_v28 = vrot.slane %v1032_v24, %v2531_v9 }
 0x341   : > { %v1079_v35 = vsel %vm933_vm5, %v1060_v28, %v1078_v33  ;;  %v1143_v33 = vld [vmem:[%s2796_s3 + $0x28] sm:$0xff] }
 0x342   : > { %v1035_v25 = vpop.permute.xlu0 %1034 }
 0x343   : > { %v1064_v29 = vrot.slane %v1035_v25, %v2531_v9 }
 0x345   : > { %v1080_v36 = vsel %vm935_vm6, %v1064_v29, %v1079_v35 }
 0x346   : > { %v1038_v5 = vpop.permute.xlu0 %1037 }
 0x347   : > { %v1068_v32 = vrot.slane %v1038_v5, %v2531_v9  ;;  %v1141_v5 = vld [vmem:[%s2796_s3 + $0x18] sm:$0xff] }
 0x349   : > { %v1081_v38 = vsel %vm937_vm7, %v1068_v32, %v1080_v36 }
 0x34a   : > { %v1041_v30 = vpop.permute.xlu0 %1040 }
 0x34b   : > { %v1072_v34 = vrot.slane %v1041_v30, %v2531_v9 }
 0x34d   : > { %v1082_v40 = vsel %vm939_vm8, %v1072_v34, %v1081_v38 }
 0x34e   : > { %v1044_v37 = vpop.permute.xlu0 %1043 }
 0x34f   : > { %v1076_v39 = vrot.slane %v1044_v37, %v2531_v9 }
 0x351   : > { %v1083_v43 = vsel %vm941_vm9, %v1076_v39, %v1082_v40 }
 0x352   : > { %v1085_v44 = vsel %vm944_vm10, %v1083_v43, 0.0 }
 0x353   : > { %1086 = vadd.xlane.f32.xlu0 %v1085_v44 }
 0x3dc   : > { %v1087_v45 = vpop.xlane.xlu0 %1086 }
 0x3dd   : > { %2233 = vrcp.f32 %v1087_v45  ;;  %v1144_v45 = vld [vmem:[%s2796_s3 + $0x30] sm:$0xff] }
 0x3ea   : > { %v2234_v46 = vpop.eup %2233 }
 0x3eb   : > { %v1109_v47 = vrot.slane %v2234_v46, %v2432_v15  ;;  %v1093_v48 = vrot.slane %v2234_v46, %v2429_v14  ;;  %v1097_v51 = vrot.slane %v2234_v46, %v2419_v11  ;;  %v1101_v53 = vrot.slane %v2234_v46, %v2422_v12  ;;  %v1253_v12 = vld [vmem:[%s2801_s8 + $0x18] sm:$0xff] }
 0x3ec   : > { %v1105_v56 = vrot.slane %v2234_v46, %v2444_v20  ;;  %v1113_v59 = vrot.slane %v2234_v46, %v2456_v23  ;;  %v1117_v14 = vrot.slane %v2234_v46, %v2508_v42  ;;  %v1121_v11 = vrot.slane %v2234_v46, %v2505_v41  ;;  %v1257_v20 = vld [vmem:[%s2802_s9 + $0x18] sm:$0xff]  ;;  %v1252_v23 = vld [vmem:[%s2801_s8 + $0x10] sm:$0xff]  ;;  %2116 = vmatpush3.msra.mxu0 %v1253_v12  ;;  %v1251_v42 = vld [vmem:[%s2801_s8 + $0x8] sm:$0xff] }
 0x3ed   : > { %v1134_v49 = vmul.f32 %v2226_v17, %v1109_v47  ;;  %v1130_v50 = vmul.f32 %v2218_v58, %v1093_v48  ;;  %v1131_v9 = vmul.f32 %v2220_v2, %v1097_v51  ;;  %v1132_v54 = vmul.f32 %v2222_v7, %v1101_v53  ;;  %2105 = vmatpush3.msra.mxu1 %v1257_v20  ;;  %v1256_v41 = vld [vmem:[%s2802_s9 + $0x10] sm:$0xff]  ;;  %v1250_v58 = vld [vmem:[%s2801_s8] sm:$0xff] }
 0x3ee   : > { %v1133_v10 = vmul.f32 %v2224_v13, %v1105_v56  ;;  %v1135_v15 = vmul.f32 %v2228_v18, %v1113_v59  ;;  %v1136_v52 = vmul.f32 %v2230_v1, %v1117_v14  ;;  %v1137_v55 = vmul.f32 %v2232_v19, %v1121_v11  ;;  %2117 = vmatprep.subr.mxu0 %v2259_v6  ;;  %v1140_v1 = vld [vmem:[%s2796_s3 + $0x10] sm:$0xff]  ;;  %v1145_v59 = vld [vmem:[%s2796_s3 + $0x38] sm:$0xff] }
 0x3ef   : > { %1168 = vperm.xlu0 %2199, %v1134_v49   ;;  %1148 = vperm.xlu1 %2200, %v1130_v50  }
 0x3f0   : > { %2106 = vmatprep.subr.mxu1 %v2259_v6  ;;  %2118 = vmatpush3.msra.mxu0 %v1252_v23 }
 0x3f1   : > { %2107 = vmatpush3.msra.mxu1 %v1256_v41  ;;  %2119 = vmatprep.subr.mxu0 %v2259_v6 }
 0x3f2   : > { %2108 = vmatprep.subr.mxu1 %v2259_v6  ;;  %2120 = vmatpush3.msra.mxu0 %v1251_v42 }
 0x3f3   : > { %1153 = vperm.xlu1 %2200, %v1131_v9   ;;  %2109 = vmatpush3.msra.mxu1 %v1255_v61 }
 0x3f4   : > { %2121 = vmatprep.subr.mxu0 %v2259_v6  ;;  %2110 = vmatprep.subr.mxu1 %v2259_v6 }
 0x3f5   : > { %2122 = vmatpush3.msra.mxu0 %v1250_v58  ;;  %2111 = vmatpush3.msra.mxu1 %v1254_v63 }
 0x3f6   : > { %2124 = vmatmul.mubr.msk.f32.vlgmr.msra.gmra.mxu0 %vm562_vm2, %v555_v0  ;;  %2126 = vmatprep.subr.mxu1 %v2259_v6 }
 0x3f7   : > { %1158 = vperm.xlu1 %2200, %v1132_v54   ;;  %2137 = vmatprep.subr.mxu0 %v2259_v6 }
 0x3f8   : > { %2145 = vmatprep.mubr.msk.f32.mxu0 %vm2260_vm1, %v2259_v6 }
 0x3fb   : > { %1163 = vperm.xlu1 %2200, %v1133_v10  }
 0x3ff   : > { %1173 = vperm.xlu1 %2200, %v1135_v15  }
 0x403   : > { %1178 = vperm.xlu1 %2200, %v1136_v52  }
 0x407   : > { %1183 = vperm.xlu1 %2200, %v1137_v55  }
 0x46a   : > { %v1149_v2 = vpop.permute.xlu1 %1148  ;;  %v1169_v13 = vpop.permute.xlu0 %1168 }
 0x46b   : > { %v1186_v62 = vmul.f32 %v1149_v2, %v1138_v57  ;;  %v1190_v21 = vmul.f32 %v1169_v13, %v1142_v60 }
 0x46d   : > { %v1194_v18 = vsel %vm562_vm2, %v1186_v62, 0.0  ;;  %v1222_v26 = vsel %vm562_vm2, %v1190_v21, 0.0 }
 0x46e   : > { %v1154_v7 = vpop.permute.xlu1 %1153  ;;  %v1195_v24 = vrot.slane %v1194_v18, 4  ;;  %v1223_v34 = vrot.slane %v1222_v26, 4 }
 0x46f   : > { %v1187_v17 = vmul.f32 %v1154_v7, %v1139_v4 }
 0x470   : > { %v1196_v30 = vadd.f32 %v1195_v24, %v1194_v18  ;;  %v1224_v46 = vadd.f32 %v1223_v34, %v1222_v26 }
 0x471   : > { %v1201_v19 = vsel %vm562_vm2, %v1187_v17, 0.0 }
 0x472   : > { %v1202_v22 = vrot.slane %v1201_v19, 4  ;;  %v1159_v3 = vpop.permute.xlu1 %1158  ;;  %v1197_v39 = vrot.slane %v1196_v30, 2  ;;  %v1225_v15 = vrot.slane %v1224_v46, 2 }
 0x473   : > { %v1188_v25 = vmul.f32 %v1159_v3, %v1140_v1 }
 0x474   : > { %v1203_v27 = vadd.f32 %v1202_v22, %v1201_v19  ;;  %v1198_v9 = vadd.f32 %v1197_v39, %v1196_v30  ;;  %v1226_v63 = vadd.f32 %v1225_v15, %v1224_v46 }
 0x475   : > { %v1208_v8 = vsel %vm562_vm2, %v1188_v25, 0.0 }
 0x476   : > { %v1209_v28 = vrot.slane %v1208_v8, 4  ;;  %v1164_v29 = vpop.permute.xlu1 %1163  ;;  %v1204_v36 = vrot.slane %v1203_v27, 2  ;;  %v1199_v20 = vrot.slane %v1198_v9, 1  ;;  %v1227_v1 = vrot.slane %v1226_v63, 1 }
 0x477   : > { %v1189_v31 = vmul.f32 %v1164_v29, %v1141_v5 }
 0x478   : > { %v1210_v32 = vadd.f32 %v1209_v28, %v1208_v8  ;;  %v1205_v48 = vadd.f32 %v1204_v36, %v1203_v27  ;;  %v1200_v4 = vadd.f32 %v1199_v20, %v1198_v9  ;;  %v1228_v8 = vadd.f32 %v1227_v1, %v1226_v63  ;;  %v1432_v36 = vld [vmem:[%s2804_s11 + $0x18] sm:$0xff] }
 0x479   : > { %v1215_v35 = vsel %vm562_vm2, %v1189_v31, 0.0  ;;  %2138 = vmatpush3.msra.mxu0 %v1432_v36 }
 0x47a   : > { %v1216_v37 = vrot.slane %v1215_v35, 4  ;;  %v1174_v38 = vpop.permute.xlu1 %1173  ;;  %v1211_v40 = vrot.slane %v1210_v32, 2  ;;  %v1206_v52 = vrot.slane %v1205_v48, 1  ;;  %2139 = vmatprep.subr.mxu0 %v2259_v6 }
 0x47b   : > { %v1191_v43 = vmul.f32 %v1174_v38, %v1143_v33  ;;  %v1431_v38 = vld [vmem:[%s2804_s11 + $0x10] sm:$0xff] }
 0x47c   : > { %v1217_v44 = vadd.f32 %v1216_v37, %v1215_v35  ;;  %v1212_v53 = vadd.f32 %v1211_v40, %v1210_v32  ;;  %v1207_v57 = vadd.f32 %v1206_v52, %v1205_v48  ;;  %v1436_v32 = vld [vmem:[%s2805_s12 + $0x18] sm:$0xff]  ;;  %v1435_v35 = vld [vmem:[%s2805_s12 + $0x10] sm:$0xff]  ;;  %v1434_v37 = vld [vmem:[%s2805_s12 + $0x8] sm:$0xff]  ;;  %2140 = vmatpush3.msra.mxu0 %v1431_v38 }
 0x47d   : > { %v1229_v47 = vsel %vm562_vm2, %v1191_v43, 0.0  ;;  %v1433_v40 = vld [vmem:[%s2805_s12] sm:$0xff]  ;;  %v1430_v43 = vld [vmem:[%s2804_s11 + $0x8] sm:$0xff]  ;;  %2141 = vmatprep.subr.mxu0 %v2259_v6 }
 0x47e   : > { %v1218_v49 = vrot.slane %v1217_v44, 2  ;;  %v1230_v50 = vrot.slane %v1229_v47, 4  ;;  %v1179_v51 = vpop.permute.xlu1 %1178  ;;  %v1213_v23 = vrot.slane %v1212_v53, 1  ;;  %v1266_v19 = vsel %vm929_vm3, %v1207_v57, %v1200_v4  ;;  %2142 = vmatpush3.msra.mxu0 %v1430_v43  ;;  %v2041_v57 = vld [vmem:[%s2805_s12 + $0x38] sm:$0xff]  ;;  %v2036_v4 = vld [vmem:[%s2804_s11 + $0x30] sm:$0xff]  ;;  %v1837_v43 = vld [vmem:[%s2807_s14 + $0x8] sm:$0xff] }
 0x47f   : > { %v1192_v54 = vmul.f32 %v1179_v51, %v1144_v45  ;;  %v1429_v45 = vld [vmem:[%s2804_s11] sm:$0xff]  ;;  %2143 = vmatprep.subr.mxu0 %v2259_v6 }
 0x480   : > { %v1219_v56 = vadd.f32 %v1218_v49, %v1217_v44  ;;  %v1231_v10 = vadd.f32 %v1230_v50, %v1229_v47  ;;  %v1214_v7 = vadd.f32 %v1213_v23, %v1212_v53  ;;  %v1427_v44 = vld [vmem:[#allocation2] sm:$0xff]  ;;  %2144 = vmatpush3.msra.mxu0 %v1429_v45  ;;  %v1428_v23 = vld [vmem:[#allocation3] sm:$0xff] }
 0x481   : > { %v1236_v14 = vsel %vm562_vm2, %v1192_v54, 0.0  ;;  %2159 = vmatprep.subr.mxu0 %v2259_v6  ;;  %v2028_v47 = vld [vmem:[%s2803_s10] ss:$0 sm:$0xff] }
 0x482   : > { %v1232_v11 = vrot.slane %v1231_v10, 2  ;;  %v1237_v55 = vrot.slane %v1236_v14, 4  ;;  %v1184_v12 = vpop.permute.xlu1 %1183  ;;  %v1220_v42 = vrot.slane %v1219_v56, 1  ;;  %v1267_v3 = vsel %vm931_vm4, %v1214_v7, %v1266_v19  ;;  %v2039_v7 = vld [vmem:[%s2805_s12 + $0x28] sm:$0xff] }
 0x483   : > { %v1193_v41 = vmul.f32 %v1184_v12, %v1145_v59 }
 0x484   : > { %v1233_v61 = vadd.f32 %v1232_v11, %v1231_v10  ;;  %v1238_v58 = vadd.f32 %v1237_v55, %v1236_v14  ;;  %v1221_v60 = vadd.f32 %v1220_v42, %v1219_v56  ;;  %v2031_v56 = vld [vmem:[%s2806_s13] ss:$0 sm:$0xff] }
 0x485   : > { %v1243_v0 = vsel %vm562_vm2, %v1193_v41, 0.0 }
 0x486   : > { %v1239_v2 = vrot.slane %v1238_v58, 2  ;;  %v1244_v62 = vrot.slane %v1243_v0, 4  ;;  %v1234_v13 = vrot.slane %v1233_v61, 1  ;;  %v1268_v24 = vsel %vm933_vm5, %v1221_v60, %v1267_v3  ;;  %v2035_v60 = vld [vmem:[%s2804_s11 + $0x28] sm:$0xff] }
 0x487   : > { %v1269_v28 = vsel %vm935_vm6, %v1228_v8, %v1268_v24 }
 0x488   : > { %v1240_v17 = vadd.f32 %v1239_v2, %v1238_v58  ;;  %v1245_v18 = vadd.f32 %v1244_v62, %v1243_v0  ;;  %v1235_v25 = vadd.f32 %v1234_v13, %v1233_v61  ;;  %v2040_v2 = vld [vmem:[%s2805_s12 + $0x30] sm:$0xff]  ;;  %v2037_v62 = vld [vmem:[%s2804_s11 + $0x38] sm:$0xff]  ;;  %v2038_v13 = vld [vmem:[%s2805_s12 + $0x20] sm:$0xff] }
 0x48a   : > { %v1241_v21 = vrot.slane %v1240_v17, 1  ;;  %v1246_v22 = vrot.slane %v1245_v18, 2  ;;  %v1270_v30 = vsel %vm937_vm7, %v1235_v25, %v1269_v28  ;;  %v2045_v25 = vld [vmem:[%s2806_s13 + $0x1] ss:$0 sm:$0xff] }
 0x48c   : > { %v1247_v5 = vadd.f32 %v1246_v22, %v1245_v18  ;;  %v1242_v26 = vadd.f32 %v1241_v21, %v1240_v17  ;;  %v2034_v17 = vld [vmem:[%s2804_s11 + $0x20] sm:$0xff]  ;;  %v1632_v21 = vld [vmem:[#allocation3 + $0x8] sm:$0xff] }
 0x48e   : > { %v1248_v27 = vrot.slane %v1247_v5, 1  ;;  %v1271_v31 = vsel %vm939_vm8, %v1242_v26, %v1270_v30 }
 0x490   : > { %v1249_v29 = vadd.f32 %v1248_v27, %v1247_v5 }
 0x492   : > { %v1272_v33 = vsel %vm941_vm9, %v1249_v29, %v1271_v31 }
 0x493   : > { %2113 = vmatmul.mubr.msk.f32.vlgmr.msra.gmra.mxu1 %vm562_vm2, %v1272_v33 }
 0x494   : > { %2127 = vmatpush3.msra.mxu1 %v1436_v32  ;;  %2134 = vmatprep.mubr.msk.f32.mxu1 %vm2260_vm1, %v2259_v6 }
 0x495   : > { %2128 = vmatprep.subr.mxu1 %v2259_v6 }
 0x496   : > { %2129 = vmatpush3.msra.mxu1 %v1435_v35 }
 0x497   : > { %2130 = vmatprep.subr.mxu1 %v2259_v6 }
 0x498   : > { %2131 = vmatpush3.msra.mxu1 %v1434_v37 }
 0x499   : > { %2132 = vmatprep.subr.mxu1 %v2259_v6 }
 0x49a   : > { %2133 = vmatpush3.msra.mxu1 %v1433_v40  ;;  %v1838_v40 = vld [vmem:[%s2807_s14 + $0x10] sm:$0xff] }
 0x49b   : > { %2135 = vmatmul.mubr.msk.f32.vlgmr.msra.gmra.mxu1 %vm562_vm2, %v1427_v44  ;;  %2148 = vmatprep.subr.mxu1 %v2259_v6  ;;  %v1836_v44 = vld [vmem:[%s2807_s14] sm:$0xff] }
 0x49c   : > { %2156 = vmatprep.mubr.msk.f32.mxu1 %vm2260_vm1, %v2259_v6  ;;  %2149 = vmatpush3.msra.mxu1 %v2041_v57 }
 0x49d   : > { %2150 = vmatprep.subr.mxu1 %v2259_v6 }
 0x49e   : > { %2151 = vmatpush3.msra.mxu1 %v2040_v2 }
 0x49f   : > { %2152 = vmatprep.subr.mxu1 %v2259_v6 }
 0x4a0   : > { %2153 = vmatpush3.msra.mxu1 %v2039_v7 }
 0x4a1   : > { %2154 = vmatprep.subr.mxu1 %v2259_v6 }
 0x4a2   : > { %2155 = vmatpush3.msra.mxu1 %v2038_v13 }
 0x4a3   : > { %2157 = vmatmul.mubr.msk.f32.vlgmr.msra.gmra.mxu1 %vm562_vm2, %v2434_v16  ;;  %2170 = vmatprep.subr.mxu1 %v2259_v6 }
 0x4a4   : > { %2178 = vmatprep.mubr.msk.f32.mxu1 %vm2260_vm1, %v2259_v6 }
 0x4b6   : > { %v1414_v34 = vpop.f32.mrf.mxu0 }
 0x4b8   : > { %v2125_v39 = vpop.f32.mrf.mxu0 }
 0x4b9   : > { %v1839_v39 = vld [vmem:[%s2807_s14 + $0x18] sm:$0xff] }
 0x4ba   : > { %2171 = vmatpush3.msra.mxu1 %v1839_v39 }
 0x4bb   : > { %2172 = vmatprep.subr.mxu1 %v2259_v6 }
 0x4bc   : > { %2173 = vmatpush3.msra.mxu1 %v1838_v40 }
 0x4bd   : > { %2174 = vmatprep.subr.mxu1 %v2259_v6 }
 0x4be   : > { %2175 = vmatpush3.msra.mxu1 %v1837_v43 }
 0x4bf   : > { %2176 = vmatprep.subr.mxu1 %v2259_v6 }
 0x4c0   : > { %2177 = vmatpush3.msra.mxu1 %v1836_v44 }
 0x553   : > { %v1341_v46 = vpop.f32.mrf.mxu1 }
 0x554   : > { %v1415_v48 = vadd.f32 %v1414_v34, %v1341_v46 }
 0x555   : > { %v2114_v49 = vpop.f32.mrf.mxu1 }
 0x556   : > { %v1425_v50 = vadd.f32 %v2028_v47, %v1415_v48  ;;  %v2048_v49 = vld [vmem:[%s2808_s15] ss:$0 sm:$0xff] }
 0x558   : > { %v1426_v51 = vmax.f32 %v1425_v50, 0.0 }
 0x55a   : > { %2146 = vmatmul.mubr.msk.f32.vlgmr.msra.gmra.mxu0 %vm562_vm2, %v1426_v51 }
 0x55b   : > { %2167 = vmatprep.mubr.msk.f32.mxu0 %vm2260_vm1, %v2259_v6  ;;  %v1506_v9 = vpop.f32.mrf.mxu1  ;;  %2160 = vmatpush3.msra.mxu0 %v2037_v62 }
 0x55c   : > { %2161 = vmatprep.subr.mxu0 %v2259_v6 }
 0x55d   : > { %v2136_v53 = vpop.f32.mrf.mxu1  ;;  %2162 = vmatpush3.msra.mxu0 %v2036_v4 }
 0x55e   : > { %2163 = vmatprep.subr.mxu0 %v2259_v6 }
 0x55f   : > { %2164 = vmatpush3.msra.mxu0 %v2035_v60 }
 0x560   : > { %2165 = vmatprep.subr.mxu0 %v2259_v6 }
 0x561   : > { %2166 = vmatpush3.msra.mxu0 %v2034_v17 }
 0x563   : > { %v1712_v22 = vpop.f32.mrf.mxu1 }
 0x565   : > { %v2158_v3 = vpop.f32.mrf.mxu1 }
 0x61a   : > { %v1579_v54 = vpop.f32.mrf.mxu0 }
 0x61b   : > { %v1580_v10 = vadd.f32 %v1579_v54, %v1506_v9 }
 0x61c   : > { %v2147_v59 = vpop.f32.mrf.mxu0 }
 0x61d   : > { %v1590_v15 = vadd.f32 %v2031_v56, %v1580_v10 }
 0x61f   : > { %v2032_v14 = vmul.f32 -1.442695, %v1590_v15 }
 0x621   : > { %2235 = vpow2.f32 %v2032_v14 }
 0x62e   : > { %v2236_v52 = vpop.eup %2235 }
 0x62f   : > { %v1594_v11 = vadd.f32 1.0, %v2236_v52 }
 0x631   : > { %2237 = vrcp.f32 %v1594_v11 }
 0x63e   : > { %v2238_v55 = vpop.eup %2237 }
 0x63f   : > { %v1597_v12 = vmul.f32 2.0, %v2238_v55 }
 0x641   : > { %v2033_v20 = vadd.f32 -1.0, %v1597_v12 }
 0x643   : > { %1605 = vrot.lane.b32.xlu1 %v2033_v20, %s2263_s28 }
 0x647   : > { %1600 = vrot.lane.b32.xlu1 %v1428_v23, %s2264_s29 }
 0x6b5   : > { %v1606_v41 = vpop.permute.xlu1 %1605 }
 0x6b6   : > { %v1608_v42 = vmul.f32 %v2238_v55, %v1606_v41 }
 0x6b8   : > { %1610 = vrot.lane.b32.xlu1 %v1608_v42, %s2264_s29 }
 0x6b9   : > { %v1601_v61 = vpop.permute.xlu1 %1600 }
 0x6ba   : > { %v1603_v58 = vmul.f32 %v2238_v55, %v1601_v61 }
 0x72a   : > { %v1611_v63 = vpop.permute.xlu1 %1610 }
 0x72b   : > { %v2711_v0 = vadd.f32 %v1611_v63, %v1603_v58 }
 0x72d   : > { %2239 = vtanh.f32 %v2711_v0 }
 0x73a   : > { %v2240_v18 = vpop.eup %2239 }
 0x73b   : > { %1616 = vrot.lane.b32.xlu0 %v2240_v18, %s2263_s28 }
 0x7ad   : > { %v1617_v1 = vpop.permute.xlu0 %1616 }
 0x7ae   : > { %v1619_v19 = vmul.f32 %v2238_v55, %v1617_v1 }
 0x7b0   : > { %1621 = vrot.lane.b32.xlu1 %v1619_v19, %s2264_s29 }
 0x7b4   : > { %1806 = vrot.lane.b32.xlu1 %v1632_v21, %s2264_s29 }
 0x822   : > { %v1622_v24 = vpop.permute.xlu1 %1621 }
 0x823   : > { %1624 = vst.msk [vmem:[#allocation2] sm:$0xff] %vm562_vm2, %v1622_v24  ;;  %2168 = vmatmul.mubr.msk.f32.vlgmr.msra.gmra.mxu0 %vm562_vm2, %v1622_v24 }
 0x826   : > { %v1807_v35 = vpop.permute.xlu1 %1806 }
 0x8e3   : > { %v1784_v16 = vpop.f32.mrf.mxu0 }
 0x8e4   : > { %v1785_v5 = vadd.f32 %v1784_v16, %v1712_v22 }
 0x8e5   : > { %v2169_v8 = vpop.f32.mrf.mxu0 }
 0x8e6   : > { %v1796_v26 = vadd.f32 %v2045_v25, %v1785_v5 }
 0x8e8   : > { %v2046_v27 = vmul.f32 -1.442695, %v1796_v26 }
 0x8ea   : > { %2241 = vpow2.f32 %v2046_v27 }
 0x8f7   : > { %v2242_v28 = vpop.eup %2241 }
 0x8f8   : > { %v1800_v29 = vadd.f32 1.0, %v2242_v28 }
 0x8fa   : > { %2243 = vrcp.f32 %v1800_v29 }
 0x907   : > { %v2244_v30 = vpop.eup %2243 }
 0x908   : > { %v1803_v31 = vmul.f32 2.0, %v2244_v30  ;;  %v1809_v36 = vmul.f32 %v2244_v30, %v1807_v35 }
 0x90a   : > { %v2047_v32 = vadd.f32 -1.0, %v1803_v31 }
 0x90c   : > { %1811 = vrot.lane.b32.xlu0 %v2047_v32, %s2263_s28 }
 0x97e   : > { %v1812_v33 = vpop.permute.xlu0 %1811 }
 0x97f   : > { %v1814_v34 = vmul.f32 %v2244_v30, %v1812_v33 }
 0x981   : > { %1816 = vrot.lane.b32.xlu0 %v1814_v34, %s2264_s29 }
 0x9f3   : > { %v1817_v37 = vpop.permute.xlu0 %1816 }
 0x9f4   : > { %v1819_v38 = vadd.f32 %v1817_v37, %v1809_v36 }
 0x9f6   : > { %2245 = vtanh.f32 %v1819_v38 }
 0xa03   : > { %v2246_v45 = vpop.eup %2245 }
 0xa04   : > { %1822 = vrot.lane.b32.xlu1 %v2246_v45, %s2263_s28  ;;  %s2266_s28 = smov (!%p2050_p5), 32  }
 0xa76   : > { %v1823_v46 = vpop.permute.xlu1 %1822 }
 0xa77   : > { %v1825_v47 = vmul.f32 %v2244_v30, %v1823_v46 }
 0xa79   : > { %1827 = vrot.lane.b32.xlu0 %v1825_v47, %s2264_s29  ;;  %s2267_s29 = smov (!%p2050_p5), 96  }
 0xaeb   : > { %v1828_v48 = vpop.permute.xlu0 %1827 }
 0xaec   : > { %1830 = vst.msk [vmem:[#allocation2 + $0x8] sm:$0xff] %vm562_vm2, %v1828_v48  ;;  %2179 = vmatmul.mubr.msk.f32.vlgmr.msra.gmra.mxu1 %vm562_vm2, %v1828_v48 }
 0xbac   : > { %v1915_v50 = vpop.f32.mrf.mxu1 }
 0xbad   : > { %v1916_v51 = vadd.f32 %v2048_v49, %v1915_v50 }
 0xbae   : > { %v2180_v6 = vpop.f32.mrf.mxu1 }
 0xbaf   : > { %1919 = vmax.xlane.f32.xlu1 %v1916_v51 }
 0xbc0   : > { %1832 = vrot.lane.b32.xlu1 %v1819_v38, %s2265_s0 }
 0xc38   : > { %v1920_v9 = vpop.xlane.xlu1 %1919 }
 0xc39   : > { %v1921_v53 = vsub.f32 %v1916_v51, %v1920_v9 }
 0xc3b   : > { %v1922_v54 = vmul.f32 1.442695, %v1921_v53 }
 0xc3c   : > { %v1833_v56 = vpop.permute.xlu1 %1832 }
 0xc3d   : > { %2247 = vpow2.f32 %v1922_v54  ;;  %1835 = vst.msk [vmem:[#allocation3 + $0x8] sm:$0xff] %vm562_vm2, %v1833_v56 }
 0xc4a   : > { %v2248_v10 = vpop.eup %2247 }
 0xc4b   : > { %1924 = vadd.xlane.f32.xlu0 %v2248_v10 }
 0xc61   : > { %1626 = vrot.lane.b32.xlu0 %v2711_v0, %s2265_s0 }
 0xcd4   : > { %v1925_v59 = vpop.xlane.xlu0 %1924 }
 0xcd5   : > { %2249 = vlog2.f32 %v1925_v59 }
 0xcd8   : > { %v1627_v15 = vpop.permute.xlu0 %1626 }
 0xcd9   : > { %1629 = vst.msk [vmem:[#allocation3] sm:$0xff] %vm562_vm2, %v1627_v15 }
 0xce2   : > { %v2250_v14 = vpop.eup %2249 }
 0xce3   : > { %v1927_v52 = vmul.f32 0.6931472, %v2250_v14 }
 0xce5   : > { %v1928_v11 = vadd.f32 %v1927_v52, %v1920_v9  ;;  %1934 = sbr.rel (%p2050_p5) target bundleno = 3429 (0xd65), region = 92 }
 0xce7   : > { %v1929_v55 = vsub.f32 %v1916_v51, %v1928_v11 }
 0xce9   : > { %1930 = vst [vmem:[%s2379_s1] sm:$0xff] %v1929_v55 }
 0xcea   : > { %v1936_v12 = vld [vmem:[#allocation3] sm:$0xff]  ;;  %v1938_v20 = vld [vmem:[#allocation3 + $0x8] sm:$0xff]  ;;  %v1937_v23 = vld [vmem:[#allocation2 + $0x8] sm:$0xff]  ;;  %vm1952_vm11 = vcmask 523264   ;;  %vm1954_vm12 = vcmask 785408  }
 0xceb   : > { %1940 = vrot.lane.b32.xlu0 %v1936_v12, %s2266_s28  ;;  %1948 = vrot.lane.b32.xlu1 %v1938_v20, %s2267_s29  ;;  %v1935_v42 = vld [vmem:[#allocation2] sm:$0xff] }
 0xcef   : > { %1944 = vrot.lane.b32.xlu0 %v1937_v23, %s2268_s18 }
 0xd5d   : > { %v1941_v41 = vpop.permute.xlu0 %1940  ;;  %v1949_v61 = vpop.permute.xlu1 %1948 }
 0xd5e   : > { %v1951_v58 = vsel %vm562_vm2, %v1935_v42, %v1941_v41 }
 0xd61   : > { %v1945_v63 = vpop.permute.xlu0 %1944 }
 0xd62   : > { %v1953_v0 = vsel %vm1952_vm11, %v1951_v58, %v1945_v63 }
 0xd63   : > { %v1955_v57 = vsel %vm1954_vm12, %v1953_v0, %v1949_v61 }
 0xd64   : > { %1956 = vst [vmem:[%s2810_s17] sm:$0xff] %v1955_v57 }
 0xd65 PF: > { %s28_s24 = sadd.s32 1, %s2257_s24  }
 0xd66   : > { %p25_p6 = scmp.ge.s32.totalorder %s28_s24, 6  }
 0xd68   :  { %27 = sbr.rel (!%p25_p6) target bundleno = 3 (0x3), region = 135 }

</bundles_post_ra>
